<compile_context>
chip_gen: v7x
topology: tpu7x:2x2x1
jax: 0.10.0
libtpu: 0.0.40
codegen_flags: <defaults>
</compile_context>

<pallas_src>
import jax
import jax.numpy as jnp
from jax import lax
from jax.experimental import pallas as pl
from jax.experimental.pallas import tpu as pltpu

_HI = lax.Precision.HIGHEST
_NC_PAD = 128  # lane-dense head-output width (sliced back to num_classes outside)


# ----------------------------------------------------------------------------
# Fused Pallas kernel: one invocation processes all streams and all batches
# ----------------------------------------------------------------------------
def _fused_eth_kernel(x_ref, m1_ref, mfh_ref, w0_ref, b0_ref, w1_ref, b1_ref,
                      hw_ref, hb_ref, out_ref):
    """Shapes:
      x_ref  : (N, Cin)    all (stream, batch) segments concatenated along time;
                           each segment = [5 zero rows | L true rows | 5 zero rows]
      m1_ref : (N-2, 1)    mask aligned with the conv-1 "valid" output (4/6 zero halo
                           rows per segment); its shift-by-1 aligns with conv-2
      mfh_ref: (3B, N-10)  head-reduction matrix: fuses the stride-4 maxpool
                           decimation, the final mask, the 1/length mean divisor and
                           the per-(stream,batch) segmented reduction into one matmul
      w*_ref : (K, Ci, Cm) conv taps (channels-last)     b*_ref: (1, Cm)
      hw_ref : (Cm, 128)   head weight zero-padded to 128 lanes   hb_ref: (1, 128)
      out_ref: (3B, 128)   rows ordered [x_4 batch..., x_8 batch..., x batch...]
    """
    K = w0_ref.shape[0]
    N = x_ref.shape[0]
    bf = jnp.bfloat16

    w0 = w0_ref[...]
    w1 = w1_ref[...]
    b0 = b0_ref[...]
    b1 = b1_ref[...]
    m1 = m1_ref[...]

    def conv_relu(h, m, w, b):
        # "valid" conv over the zero-halo'd signal: every tap is a unit-stride static
        # slice feeding one tall 2-D MXU matmul (batch + streams folded into M).
        # (conv + bias) * mask then ReLU == MaskedConv1D(bias=True) -> Identity
        # (with_ln=False) -> ReLU, and the mask re-zeroes the halo rows.
        Lo = h.shape[0] - (K - 1)
        acc = jnp.dot(h[0:Lo, :].astype(bf), w[0].astype(bf),
                      preferred_element_type=jnp.float32)
        for k in range(1, K):
            acc = acc + jnp.dot(h[k:k + Lo, :].astype(bf), w[k].astype(bf),
                                preferred_element_type=jnp.float32)
        return jnp.maximum((acc + b) * m, 0.0)

    # --- embd stack: MaskedConv1D -> Identity -> ReLU, twice (shared weights) ---
    h = conv_relu(x_ref[...], m1, w0, b0)               # (N-2, Cm)
    c = conv_relu(h, m1[1:1 + (N - 4), :], w1, b1)       # (N-4, Cm)

    # TODO(synk): stem / branch_1 / branch_2 THR_layers are not defined in the
    # provided source, so they are identity pass-throughs of (features, masks).

    # --- two fused MaxPool1d(3, stride=2, padding=1) stages ---
    # pool(pool(c))[j] == max(c[4j-3 : 4j+4]); the stride-4 decimation is folded into
    # mfh, so only a 7-wide running max (pure VPU, no strided slices / gathers /
    # selection matmuls / iotas) is computed here.
    Lw = N - 10
    win = c[0:Lw, :]
    for d in range(1, 7):
        win = jnp.maximum(win, c[d:d + Lw, :])

    # --- head: (x * mask).mean(dim=2) + nn.Linear for every (stream, batch) row ---
    s = jnp.dot(mfh_ref[...].astype(bf), win.astype(bf),
                preferred_element_type=jnp.float32)                    # (3B, Cm)
    out_ref[...] = jnp.dot(s.astype(bf), hw_ref[...].astype(bf),
                           preferred_element_type=jnp.float32) + hb_ref[...]


# ----------------------------------------------------------------------------
# eth_net forward (training branch), arch=(2, 2, 1, 1), with_ln=False, use_pos=False
# ----------------------------------------------------------------------------
def eth_net_forward(params, x_4, x_8, x, mask_4, mask_8, mask):
    """Inputs follow the PyTorch layout: x_* (B, C, T), mask_* (B, 1, T) in {0, 1}.
    Returns (out_4, out_8, out), each (B, num_classes)."""
    (w0, b0), (w1, b1) = params["embd"]
    hw, hb = params["head"]
    NC = hw.shape[1]
    hw_p = jnp.pad(hw.astype(jnp.float32), ((0, 0), (0, _NC_PAD - NC)))
    hb_p = jnp.pad(hb.astype(jnp.float32), ((0, 0), (0, _NC_PAD - NC)))

    to_cl = lambda a: jnp.transpose(a.astype(jnp.float32), (0, 2, 1))
    xs = [to_cl(x_4), to_cl(x_8), to_cl(x)]            # (B, L_s, Cin), stream order 4,8,1
    ms = [to_cl(mask_4), to_cl(mask_8), to_cl(mask)]   # (B, L_s, 1)
    B, _, Cin = xs[0].shape

    # Each (stream, batch) becomes one time segment [5 zeros | L true | 5 zeros]
    # (1 zero of reach per conv + 3 for the fused double-maxpool window); short streams
    # are NOT padded up to the common max length.
    segs_x, segs_m, seg_LS = [], [], []
    for xc, mc in zip(xs, ms):
        L = xc.shape[1]
        assert L % 4 == 0 and L >= 4, L
        S = L + 10
        seg_LS.append((L, S))
        segs_x.append(jnp.pad(xc, ((0, 0), (5, 5), (0, 0))).reshape(B * S, Cin))
        segs_m.append(jnp.pad(mc, ((0, 0), (4, 6), (0, 0))).reshape(B * S, 1))
    X = jnp.concatenate(segs_x, axis=0)                # (N, Cin)
    N = X.shape[0]
    M1 = jnp.concatenate(segs_m, axis=0)[:N - 2]       # (N-2, 1)

    # Head-reduction matrix (3B, N-10): row (stream, batch) has mask[b, 4j] / (L/4) at
    # the column of the segment's j-th pooled position; everything else is zero.
    rows = []
    off = 0
    for mc, (L, S) in zip(ms, seg_LS):
        Lf = L // 4
        keep = (jnp.arange(L) % 4 == 0).astype(jnp.float32)       # nearest x4 downsample
        w = mc[:, :, 0] * keep[None, :] * (1.0 / float(Lf))       # (B, L)
        w = jnp.pad(w, ((0, 0), (0, S - L)))                       # (B, S)
        blk = (jnp.eye(B, dtype=jnp.float32)[:, :, None] * w[:, None, :]
               ).reshape(B, B * S)                                 # per-batch block diag
        rows.append(jnp.pad(blk, ((0, 0), (off, N - off - B * S))))
        off += B * S
    MFH = jnp.concatenate(rows, axis=0)[:, :N - 10]                # (3B, N-10)

    def fullspec(a):
        nd = a.ndim
        return pl.BlockSpec(a.shape, lambda i, _n=nd: (0,) * _n)

    args = (X, M1, MFH, w0, b0, w1, b1, hw_p, hb_p)
    out = pl.pallas_call(
        _fused_eth_kernel,
        out_shape=jax.ShapeDtypeStruct((3 * B, _NC_PAD), jnp.float32),
        grid=(1,),
        in_specs=[fullspec(a) for a in args],
        out_specs=pl.BlockSpec((3 * B, _NC_PAD), lambda i: (0, 0)),
        compiler_params=pltpu.CompilerParams(dimension_semantics=("arbitrary",)),
    )(*args)
    out = out.reshape(3, B, _NC_PAD)[:, :, :NC]
    return out[0], out[1], out[2]


# ----------------------------------------------------------------------------
# Pure-JAX reference (same math, no Pallas, f32 HIGHEST) for a correctness check
# ----------------------------------------------------------------------------
def _ref_conv_relu(x, mask, w, b):
    B, T, Cin = x.shape
    K = w.shape[0]
    pad = K // 2
    xp = jnp.pad(x, ((0, 0), (pad, pad), (0, 0)))
    acc = jnp.zeros((B, T, w.shape[2]), jnp.float32)
    for k in range(K):
        acc = acc + jnp.einsum("btc,cd->btd", xp[:, k:k + T, :], w[k], precision=_HI)
    return jnp.maximum((acc + b[None]) * mask, 0.0)


def _ref_down(x, mask):
    B, T, C = x.shape
    To = T // 2
    xp = jnp.pad(x, ((0, 0), (1, 1), (0, 0)), constant_values=-jnp.inf)
    pooled = jnp.maximum(jnp.maximum(xp[:, 0:2 * To:2], xp[:, 1:2 * To + 1:2]),
                         xp[:, 2:2 * To + 2:2])
    return pooled, mask[:, ::2, :]


def _ref_forward(params, x_4, x_8, x, m_4, m_8, m):
    to_cl = lambda a: jnp.transpose(a.astype(jnp.float32), (0, 2, 1))
    xs = [to_cl(x_4), to_cl(x_8), to_cl(x)]
    ms = [to_cl(m_4), to_cl(m_8), to_cl(m)]
    for (w, b) in params["embd"]:
        xs = [_ref_conv_relu(xi, mi, w, b) for xi, mi in zip(xs, ms)]
    for _ in range(2):
        pairs = [_ref_down(xi, mi) for xi, mi in zip(xs, ms)]
        xs = [p[0] for p in pairs]
        ms = [p[1] for p in pairs]
    hw, hb = params["head"]
    outs = []
    for xi, mi in zip(xs, ms):
        s = jnp.mean(xi * mi, axis=1)
        outs.append(jnp.dot(s, hw, precision=_HI) + hb)
    return tuple(outs)


# ----------------------------------------------------------------------------
# Main
# ----------------------------------------------------------------------------
if __name__ == "__main__":
    key = jax.random.PRNGKey(0)

    B = 2
    n_in = 4
    n_embd = 32
    num_classes = 7
    max_len = 16                      # x: T=16, x_8: T=8, x_4: T=4
    T, T8, T4 = max_len, max_len // 2, max_len // 4
    K = 3                             # thr_size[0]

    k_w0, k_w1, k_hw, k_x, k_x8, k_x4 = jax.random.split(key, 6)

    # Deterministic parameter init (biases zero, as in __init_weights__).
    params = {
        "embd": [
            (0.1 * jax.random.normal(k_w0, (K, n_in, n_embd), jnp.float32),
             jnp.zeros((1, n_embd), jnp.float32)),
            (0.1 * jax.random.normal(k_w1, (K, n_embd, n_embd), jnp.float32),
             jnp.zeros((1, n_embd), jnp.float32)),
        ],
        "head": (0.1 * jax.random.normal(k_hw, (n_embd, num_classes), jnp.float32),
                 jnp.zeros((1, num_classes), jnp.float32)),
    }

    # Inputs in PyTorch layout (B, C, T); masks (B, 1, T) with per-sample valid lengths.
    x = jax.random.normal(k_x, (B, n_in, T), jnp.float32)
    x_8 = jax.random.normal(k_x8, (B, n_in, T8), jnp.float32)
    x_4 = jax.random.normal(k_x4, (B, n_in, T4), jnp.float32)

    def make_mask(t, lengths):
        idx = jnp.arange(t)[None, :]
        return (idx < jnp.asarray(lengths)[:, None]).astype(jnp.float32)[:, None, :]

    mask = make_mask(T, [T, T - 4])
    mask_8 = make_mask(T8, [T8, T8 - 2])
    mask_4 = make_mask(T4, [T4, T4 - 1])

    fwd = jax.jit(eth_net_forward)
    out_4, out_8, out = fwd(params, x_4, x_8, x, mask_4, mask_8, mask)
    jax.block_until_ready((out_4, out_8, out))

    # Correctness check against the pure-JAX reference (kernel matmuls run in bf16
    # with f32 accumulation, hence the loosened tolerance).
    r_4, r_8, r = _ref_forward(params, x_4, x_8, x, mask_4, mask_8, mask)
    for got, want in ((out_4, r_4), (out_8, r_8), (out, r)):
        assert got.shape == (B, num_classes), got.shape
        assert jnp.allclose(got, want, atol=2e-2, rtol=2e-2), (got, want)

    print("KERNEL_OK")
</pallas_src>

<mosaic_0001>
module attributes {stable_mosaic.version = 11 : i64} {
  func.func @_fused_eth_kernel(%arg0: i32, %arg1: memref<116x4xf32, #tpu.memory_space<vmem>>, %arg2: memref<114x1xf32, #tpu.memory_space<vmem>>, %arg3: memref<6x106xf32, #tpu.memory_space<vmem>>, %arg4: memref<3x4x32xf32, #tpu.memory_space<vmem>>, %arg5: memref<1x32xf32, #tpu.memory_space<vmem>>, %arg6: memref<3x32x32xf32, #tpu.memory_space<vmem>>, %arg7: memref<1x32xf32, #tpu.memory_space<vmem>>, %arg8: memref<32x128xf32, #tpu.memory_space<vmem>>, %arg9: memref<1x128xf32, #tpu.memory_space<vmem>>, %arg10: memref<6x128xf32, #tpu.memory_space<vmem>>) attributes {dimension_semantics = [#tpu.dimension_semantics<arbitrary>], iteration_bounds = array<i64: 1>, scalar_prefetch = 0 : i64, scratch_operands = 0 : i64, tpu.core_type = #tpu.core_type<tc>, window_params = [{pipeline_mode = #tpu.pipeline_mode<synchronous>, transform_indices = @transform_0, window_bounds = array<i64: 116, 4>}, {pipeline_mode = #tpu.pipeline_mode<synchronous>, transform_indices = @transform_1, window_bounds = array<i64: 114, 1>}, {pipeline_mode = #tpu.pipeline_mode<synchronous>, transform_indices = @transform_2, window_bounds = array<i64: 6, 106>}, {pipeline_mode = #tpu.pipeline_mode<synchronous>, transform_indices = @transform_3, window_bounds = array<i64: 3, 4, 32>}, {pipeline_mode = #tpu.pipeline_mode<synchronous>, transform_indices = @transform_4, window_bounds = array<i64: 1, 32>}, {pipeline_mode = #tpu.pipeline_mode<synchronous>, transform_indices = @transform_5, window_bounds = array<i64: 3, 32, 32>}, {pipeline_mode = #tpu.pipeline_mode<synchronous>, transform_indices = @transform_6, window_bounds = array<i64: 1, 32>}, {pipeline_mode = #tpu.pipeline_mode<synchronous>, transform_indices = @transform_7, window_bounds = array<i64: 32, 128>}, {pipeline_mode = #tpu.pipeline_mode<synchronous>, transform_indices = @transform_8, window_bounds = array<i64: 1, 128>}, {pipeline_mode = #tpu.pipeline_mode<synchronous>, transform_indices = @transform_9, window_bounds = array<i64: 6, 128>}]} {
    %c0 = arith.constant 0 : index
    %c0_0 = arith.constant 0 : index
    %c0_1 = arith.constant 0 : index
    %0 = vector.load %arg4[%c0, %c0_0, %c0_1] : memref<3x4x32xf32, #tpu.memory_space<vmem>>, vector<3x4x32xf32>
    %c0_2 = arith.constant 0 : index
    %c0_3 = arith.constant 0 : index
    %c0_4 = arith.constant 0 : index
    %1 = vector.load %arg6[%c0_2, %c0_3, %c0_4] : memref<3x32x32xf32, #tpu.memory_space<vmem>>, vector<3x32x32xf32>
    %c0_5 = arith.constant 0 : index
    %c0_6 = arith.constant 0 : index
    %2 = vector.load %arg5[%c0_5, %c0_6] : memref<1x32xf32, #tpu.memory_space<vmem>>, vector<1x32xf32>
    %c0_7 = arith.constant 0 : index
    %c0_8 = arith.constant 0 : index
    %3 = vector.load %arg7[%c0_7, %c0_8] : memref<1x32xf32, #tpu.memory_space<vmem>>, vector<1x32xf32>
    %c0_9 = arith.constant 0 : index
    %c0_10 = arith.constant 0 : index
    %4 = vector.load %arg2[%c0_9, %c0_10] : memref<114x1xf32, #tpu.memory_space<vmem>>, vector<114x1xf32>
    %c0_11 = arith.constant 0 : index
    %c0_12 = arith.constant 0 : index
    %5 = vector.load %arg1[%c0_11, %c0_12] : memref<116x4xf32, #tpu.memory_space<vmem>>, vector<116x4xf32>
    %6 = vector.extract_strided_slice %5 {offsets = [0, 0], sizes = [114, 4], strides = [1, 1]} : vector<116x4xf32> to vector<114x4xf32>
    %7 = arith.truncf %6 : vector<114x4xf32> to vector<114x4xbf16>
    %8 = vector.extract_strided_slice %0 {offsets = [0, 0, 0], sizes = [1, 4, 32], strides = [1, 1, 1]} : vector<3x4x32xf32> to vector<1x4x32xf32>
    %9 = vector.shape_cast %8 : vector<1x4x32xf32> to vector<4x32xf32>
    %10 = arith.truncf %9 : vector<4x32xf32> to vector<4x32xbf16>
    %cst = arith.constant dense<0.000000e+00> : vector<114x32xf32>
    %11 = tpu.matmul %7, %10, %cst {dimension_numbers = #tpu.dot_dimension_numbers<[1], [0], [0], [1], [0, 0, 1, 1], [], []>} : vector<114x4xbf16>, vector<4x32xbf16>, vector<114x32xf32> -> vector<114x32xf32>
    %12 = vector.extract_strided_slice %5 {offsets = [1, 0], sizes = [114, 4], strides = [1, 1]} : vector<116x4xf32> to vector<114x4xf32>
    %13 = arith.truncf %12 : vector<114x4xf32> to vector<114x4xbf16>
    %14 = vector.extract_strided_slice %0 {offsets = [1, 0, 0], sizes = [1, 4, 32], strides = [1, 1, 1]} : vector<3x4x32xf32> to vector<1x4x32xf32>
    %15 = vector.shape_cast %14 : vector<1x4x32xf32> to vector<4x32xf32>
    %16 = arith.truncf %15 : vector<4x32xf32> to vector<4x32xbf16>
    %cst_13 = arith.constant dense<0.000000e+00> : vector<114x32xf32>
    %17 = tpu.matmul %13, %16, %cst_13 {dimension_numbers = #tpu.dot_dimension_numbers<[1], [0], [0], [1], [0, 0, 1, 1], [], []>} : vector<114x4xbf16>, vector<4x32xbf16>, vector<114x32xf32> -> vector<114x32xf32>
    %18 = arith.addf %11, %17 : vector<114x32xf32>
    %19 = vector.extract_strided_slice %5 {offsets = [2, 0], sizes = [114, 4], strides = [1, 1]} : vector<116x4xf32> to vector<114x4xf32>
    %20 = arith.truncf %19 : vector<114x4xf32> to vector<114x4xbf16>
    %21 = vector.extract_strided_slice %0 {offsets = [2, 0, 0], sizes = [1, 4, 32], strides = [1, 1, 1]} : vector<3x4x32xf32> to vector<1x4x32xf32>
    %22 = vector.shape_cast %21 : vector<1x4x32xf32> to vector<4x32xf32>
    %23 = arith.truncf %22 : vector<4x32xf32> to vector<4x32xbf16>
    %cst_14 = arith.constant dense<0.000000e+00> : vector<114x32xf32>
    %24 = tpu.matmul %20, %23, %cst_14 {dimension_numbers = #tpu.dot_dimension_numbers<[1], [0], [0], [1], [0, 0, 1, 1], [], []>} : vector<114x4xbf16>, vector<4x32xbf16>, vector<114x32xf32> -> vector<114x32xf32>
    %25 = arith.addf %18, %24 : vector<114x32xf32>
    %26 = vector.broadcast %2 : vector<1x32xf32> to vector<114x32xf32>
    %27 = arith.addf %25, %26 : vector<114x32xf32>
    %28 = vector.broadcast %4 : vector<114x1xf32> to vector<114x32xf32>
    %29 = arith.mulf %27, %28 : vector<114x32xf32>
    %cst_15 = arith.constant 0.000000e+00 : f32
    %30 = vector.broadcast %cst_15 : f32 to vector<114x32xf32>
    %31 = arith.maximumf %29, %30 : vector<114x32xf32>
    %32 = vector.extract_strided_slice %4 {offsets = [1, 0], sizes = [112, 1], strides = [1, 1]} : vector<114x1xf32> to vector<112x1xf32>
    %33 = vector.extract_strided_slice %31 {offsets = [0, 0], sizes = [112, 32], strides = [1, 1]} : vector<114x32xf32> to vector<112x32xf32>
    %34 = arith.truncf %33 : vector<112x32xf32> to vector<112x32xbf16>
    %35 = vector.extract_strided_slice %1 {offsets = [0, 0, 0], sizes = [1, 32, 32], strides = [1, 1, 1]} : vector<3x32x32xf32> to vector<1x32x32xf32>
    %36 = vector.shape_cast %35 : vector<1x32x32xf32> to vector<32x32xf32>
    %37 = arith.truncf %36 : vector<32x32xf32> to vector<32x32xbf16>
    %cst_16 = arith.constant dense<0.000000e+00> : vector<112x32xf32>
    %38 = tpu.matmul %34, %37, %cst_16 {dimension_numbers = #tpu.dot_dimension_numbers<[1], [0], [0], [1], [0, 0, 1, 1], [], []>} : vector<112x32xbf16>, vector<32x32xbf16>, vector<112x32xf32> -> vector<112x32xf32>
    %39 = vector.extract_strided_slice %31 {offsets = [1, 0], sizes = [112, 32], strides = [1, 1]} : vector<114x32xf32> to vector<112x32xf32>
    %40 = arith.truncf %39 : vector<112x32xf32> to vector<112x32xbf16>
    %41 = vector.extract_strided_slice %1 {offsets = [1, 0, 0], sizes = [1, 32, 32], strides = [1, 1, 1]} : vector<3x32x32xf32> to vector<1x32x32xf32>
    %42 = vector.shape_cast %41 : vector<1x32x32xf32> to vector<32x32xf32>
    %43 = arith.truncf %42 : vector<32x32xf32> to vector<32x32xbf16>
    %cst_17 = arith.constant dense<0.000000e+00> : vector<112x32xf32>
    %44 = tpu.matmul %40, %43, %cst_17 {dimension_numbers = #tpu.dot_dimension_numbers<[1], [0], [0], [1], [0, 0, 1, 1], [], []>} : vector<112x32xbf16>, vector<32x32xbf16>, vector<112x32xf32> -> vector<112x32xf32>
    %45 = arith.addf %38, %44 : vector<112x32xf32>
    %46 = vector.extract_strided_slice %31 {offsets = [2, 0], sizes = [112, 32], strides = [1, 1]} : vector<114x32xf32> to vector<112x32xf32>
    %47 = arith.truncf %46 : vector<112x32xf32> to vector<112x32xbf16>
    %48 = vector.extract_strided_slice %1 {offsets = [2, 0, 0], sizes = [1, 32, 32], strides = [1, 1, 1]} : vector<3x32x32xf32> to vector<1x32x32xf32>
    %49 = vector.shape_cast %48 : vector<1x32x32xf32> to vector<32x32xf32>
    %50 = arith.truncf %49 : vector<32x32xf32> to vector<32x32xbf16>
    %cst_18 = arith.constant dense<0.000000e+00> : vector<112x32xf32>
    %51 = tpu.matmul %47, %50, %cst_18 {dimension_numbers = #tpu.dot_dimension_numbers<[1], [0], [0], [1], [0, 0, 1, 1], [], []>} : vector<112x32xbf16>, vector<32x32xbf16>, vector<112x32xf32> -> vector<112x32xf32>
    %52 = arith.addf %45, %51 : vector<112x32xf32>
    %53 = vector.broadcast %3 : vector<1x32xf32> to vector<112x32xf32>
    %54 = arith.addf %52, %53 : vector<112x32xf32>
    %55 = vector.broadcast %32 : vector<112x1xf32> to vector<112x32xf32>
    %56 = arith.mulf %54, %55 : vector<112x32xf32>
    %cst_19 = arith.constant 0.000000e+00 : f32
    %57 = vector.broadcast %cst_19 : f32 to vector<112x32xf32>
    %58 = arith.maximumf %56, %57 : vector<112x32xf32>
    %59 = vector.extract_strided_slice %58 {offsets = [0, 0], sizes = [106, 32], strides = [1, 1]} : vector<112x32xf32> to vector<106x32xf32>
    %60 = vector.extract_strided_slice %58 {offsets = [1, 0], sizes = [106, 32], strides = [1, 1]} : vector<112x32xf32> to vector<106x32xf32>
    %61 = arith.maximumf %59, %60 : vector<106x32xf32>
    %62 = vector.extract_strided_slice %58 {offsets = [2, 0], sizes = [106, 32], strides = [1, 1]} : vector<112x32xf32> to vector<106x32xf32>
    %63 = arith.maximumf %61, %62 : vector<106x32xf32>
    %64 = vector.extract_strided_slice %58 {offsets = [3, 0], sizes = [106, 32], strides = [1, 1]} : vector<112x32xf32> to vector<106x32xf32>
    %65 = arith.maximumf %63, %64 : vector<106x32xf32>
    %66 = vector.extract_strided_slice %58 {offsets = [4, 0], sizes = [106, 32], strides = [1, 1]} : vector<112x32xf32> to vector<106x32xf32>
    %67 = arith.maximumf %65, %66 : vector<106x32xf32>
    %68 = vector.extract_strided_slice %58 {offsets = [5, 0], sizes = [106, 32], strides = [1, 1]} : vector<112x32xf32> to vector<106x32xf32>
    %69 = arith.maximumf %67, %68 : vector<106x32xf32>
    %70 = vector.extract_strided_slice %58 {offsets = [6, 0], sizes = [106, 32], strides = [1, 1]} : vector<112x32xf32> to vector<106x32xf32>
    %71 = arith.maximumf %69, %70 : vector<106x32xf32>
    %c0_20 = arith.constant 0 : index
    %c0_21 = arith.constant 0 : index
    %72 = vector.load %arg3[%c0_20, %c0_21] : memref<6x106xf32, #tpu.memory_space<vmem>>, vector<6x106xf32>
    %73 = arith.truncf %72 : vector<6x106xf32> to vector<6x106xbf16>
    %74 = arith.truncf %71 : vector<106x32xf32> to vector<106x32xbf16>
    %cst_22 = arith.constant dense<0.000000e+00> : vector<6x32xf32>
    %75 = tpu.matmul %73, %74, %cst_22 {dimension_numbers = #tpu.dot_dimension_numbers<[1], [0], [0], [1], [0, 0, 1, 1], [], []>} : vector<6x106xbf16>, vector<106x32xbf16>, vector<6x32xf32> -> vector<6x32xf32>
    %76 = arith.truncf %75 : vector<6x32xf32> to vector<6x32xbf16>
    %c0_23 = arith.constant 0 : index
    %c0_24 = arith.constant 0 : index
    %77 = vector.load %arg8[%c0_23, %c0_24] : memref<32x128xf32, #tpu.memory_space<vmem>>, vector<32x128xf32>
    %78 = arith.truncf %77 : vector<32x128xf32> to vector<32x128xbf16>
    %cst_25 = arith.constant dense<0.000000e+00> : vector<6x128xf32>
    %79 = tpu.matmul %76, %78, %cst_25 {dimension_numbers = #tpu.dot_dimension_numbers<[1], [0], [0], [1], [0, 0, 1, 1], [], []>} : vector<6x32xbf16>, vector<32x128xbf16>, vector<6x128xf32> -> vector<6x128xf32>
    %c0_26 = arith.constant 0 : index
    %c0_27 = arith.constant 0 : index
    %80 = vector.load %arg9[%c0_26, %c0_27] : memref<1x128xf32, #tpu.memory_space<vmem>>, vector<1x128xf32>
    %81 = vector.broadcast %80 : vector<1x128xf32> to vector<6x128xf32>
    %82 = arith.addf %79, %81 : vector<6x128xf32>
    %c0_28 = arith.constant 0 : index
    %c0_29 = arith.constant 0 : index
    %83 = vector.load %arg10[%c0_28, %c0_29] : memref<6x128xf32, #tpu.memory_space<vmem>>, vector<6x128xf32>
    tpu.vector_store %arg10[%c0_28, %c0_29], %82 {strides = array<i32>} : memref<6x128xf32, #tpu.memory_space<vmem>>, vector<6x128xf32>,
    return
  }
  func.func @transform_0(%arg0: i32) -> (i32, i32) {
    %c0_i32 = arith.constant 0 : i32
    %c0_i32_0 = arith.constant 0 : i32
    %c0_i32_1 = arith.constant 0 : i32
    return %c0_i32, %c0_i32_0 : i32, i32
  }
  func.func @transform_1(%arg0: i32) -> (i32, i32) {
    %c0_i32 = arith.constant 0 : i32
    %c0_i32_0 = arith.constant 0 : i32
    %c0_i32_1 = arith.constant 0 : i32
    return %c0_i32, %c0_i32_0 : i32, i32
  }
  func.func @transform_2(%arg0: i32) -> (i32, i32) {
    %c0_i32 = arith.constant 0 : i32
    %c0_i32_0 = arith.constant 0 : i32
    %c0_i32_1 = arith.constant 0 : i32
    return %c0_i32, %c0_i32_0 : i32, i32
  }
  func.func @transform_3(%arg0: i32) -> (i32, i32, i32) {
    %c0_i32 = arith.constant 0 : i32
    %c0_i32_0 = arith.constant 0 : i32
    %c0_i32_1 = arith.constant 0 : i32
    %c0_i32_2 = arith.constant 0 : i32
    return %c0_i32, %c0_i32_0, %c0_i32_1 : i32, i32, i32
  }
  func.func @transform_4(%arg0: i32) -> (i32, i32) {
    %c0_i32 = arith.constant 0 : i32
    %c0_i32_0 = arith.constant 0 : i32
    %c0_i32_1 = arith.constant 0 : i32
    return %c0_i32, %c0_i32_0 : i32, i32
  }
  func.func @transform_5(%arg0: i32) -> (i32, i32, i32) {
    %c0_i32 = arith.constant 0 : i32
    %c0_i32_0 = arith.constant 0 : i32
    %c0_i32_1 = arith.constant 0 : i32
    %c0_i32_2 = arith.constant 0 : i32
    return %c0_i32, %c0_i32_0, %c0_i32_1 : i32, i32, i32
  }
  func.func @transform_6(%arg0: i32) -> (i32, i32) {
    %c0_i32 = arith.constant 0 : i32
    %c0_i32_0 = arith.constant 0 : i32
    %c0_i32_1 = arith.constant 0 : i32
    return %c0_i32, %c0_i32_0 : i32, i32
  }
  func.func @transform_7(%arg0: i32) -> (i32, i32) {
    %c0_i32 = arith.constant 0 : i32
    %c0_i32_0 = arith.constant 0 : i32
    %c0_i32_1 = arith.constant 0 : i32
    return %c0_i32, %c0_i32_0 : i32, i32
  }
  func.func @transform_8(%arg0: i32) -> (i32, i32) {
    %c0_i32 = arith.constant 0 : i32
    %c0_i32_0 = arith.constant 0 : i32
    %c0_i32_1 = arith.constant 0 : i32
    return %c0_i32, %c0_i32_0 : i32, i32
  }
  func.func @transform_9(%arg0: i32) -> (i32, i32) {
    %c0_i32 = arith.constant 0 : i32
    %c0_i32_0 = arith.constant 0 : i32
    %c0_i32_1 = arith.constant 0 : i32
    return %c0_i32, %c0_i32_0 : i32, i32
  }
}

</mosaic_0001>

<bundles_post_ra>
// kernel: eth_net_forward.1
= control target key start
LH: loop header
LB: loop body
LE: loop exit
PB: predicated region body
PF: predicated region fallthrough
CT: control target
= control target key end

     0   :  { %vm179_vm0 = vcmask 1041408   ;;  %v2002_v8 = vmov 0   ;;  %vm90_vm1 = vsmask.f32 7424  ;;  %vm154_vm2 = vcmask 31744   ;;  %s2919_s3 = inlined_call_operand.vmem [shape: f32[3,4,32], index: 3, kind: input, shape index: {}]   ;;  %s2920_s0 = inlined_call_operand.vmem [shape: f32[116,4], index: 0, kind: input, shape index: {}]   ;;  %s2921_s1 = inlined_call_operand.vmem [shape: f32[114,1], index: 1, kind: input, shape index: {}]   ;;  %s2922_s5 = inlined_call_operand.vmem [shape: f32[3,32,32], index: 5, kind: input, shape index: {}]   ;;  %s2923_s4 = inlined_call_operand.vmem [shape: f32[1,32], index: 4, kind: input, shape index: {}]   ;;  %s2924_s6 = inlined_call_operand.vmem [shape: f32[1,32], index: 6, kind: input, shape index: {}]   ;;  %s2925_s2 = inlined_call_operand.vmem [shape: f32[6,106], index: 2, kind: input, shape index: {}]   ;;  %s2926_s7 = inlined_call_operand.vmem [shape: f32[32,128], index: 7, kind: input, shape index: {}]   ;;  %s2927_s8 = inlined_call_operand.vmem [shape: f32[1,128], index: 8, kind: input, shape index: {}]   ;;  %s2928_s9 = inlined_call_operand.vmem [shape: f32[6,128], index: 9, kind: output, shape index: {}]  }
   0x1   :  { %v34_v0 = vld [vmem:[%s2919_s3 + $0x4] sm:$0xf]  ;;  %v66_v2 = vld [vmem:[%s2920_s0 + $0x8] sm:$0xff]  ;;  %v67_v4 = vld [vmem:[%s2920_s0 + $0x10] sm:$0xff]  ;;  %2000 = vset.pattern.permute.xlu0 %v2002_v8  ;;  %2001 = vset.pattern.permute.xlu1 %v2002_v8  ;;  %vm403_vm3 = vcmask 1046528   ;;  %vm2004_vm4 = vmmov 0  }
   0x2   :  { %v65_v1 = vld [vmem:[%s2920_s0] sm:$0xff]  ;;  %v89_v3 = vpack.c.bf16 %v34_v0, %v34_v0  ;;  %v68_v5 = vld [vmem:[%s2920_s0 + $0x18] sm:$0xff]  ;;  %v70_v10 = vld [vmem:[%s2920_s0 + $0x28] sm:$0xff]  ;;  %vm755_vm5 = vcmask 261120   ;;  %vm1279_vm6 = vcmask 1045504   ;;  %vm1335_vm7 = vcmask 1044480  }
   0x3   :  { %v2070_v6 = vpack.c.bf16 %v66_v2, %v65_v1  ;;  %v69_v7 = vld [vmem:[%s2920_s0 + $0x20] sm:$0xff]  ;;  %v2075_v9 = vpack.c.bf16 %v68_v5, %v67_v4  ;;  %v71_v11 = vld [vmem:[%s2920_s0 + $0x30] sm:$0xff]  ;;  %v72_v12 = vld [vmem:[%s2920_s0 + $0x38] sm:$0xff]  ;;  %vm1391_vm8 = vcmask 1043456   ;;  %vm1447_vm9 = vcmask 1042432  }
   0x4   :  { %1993 = vmatprep.subr.msk.bf16.mxu0 %vm179_vm0, %v89_v3  ;;  %v181_v13 = vsel %vm179_vm0, %v89_v3, 0  ;;  %v2090_v16 = vpack.c.bf16 %v70_v10, %v69_v7  ;;  %v73_v17 = vld [vmem:[%s2920_s0 + $0x40] sm:$0xff]  ;;  %v74_v18 = vld [vmem:[%s2920_s0 + $0x48] sm:$0xff]  ;;  %1994 = vmatprep.subr.msk.bf16.mxu1 %vm179_vm0, %v89_v3  ;;  %v2101_v21 = vpack.c.bf16 %v72_v12, %v71_v11  ;;  %v75_v24 = vld [vmem:[%s2920_s0 + $0x50] sm:$0xff]  ;;  %vm1567_vm10 = vcmask 867328  }
   0x5   :  { %v92_v14 = vshrl.u32 %v2070_v6, 16  ;;  %v94_v15 = vshll.u32 %v2070_v6, 16  ;;  %1792 = vmatpush3.bf16.msra.mxu0 %v181_v13  ;;  %v99_v19 = vshll.u32 %v2075_v9, 16  ;;  %v103_v20 = vshrl.u32 %v2075_v9, 16  ;;  %v33_v23 = vld [vmem:[%s2919_s3] sm:$0xf]  ;;  %1968 = vmatpush3.bf16.msra.mxu1 %v181_v13 }
   0x6   :  { %v2103_v22 = vpack.c.bf16 %v74_v18, %v73_v17  ;;  %v76_v25 = vld [vmem:[%s2920_s0 + $0x58] sm:$0xff]  ;;  %v107_v27 = vshll.u32 %v2090_v16, 16  ;;  %v111_v28 = vshrl.u32 %v2090_v16, 16  ;;  %v88_v29 = vpack.c.bf16 %v33_v23, %v33_v23  ;;  %v77_v33 = vld [vmem:[%s2920_s0 + $0x60] sm:$0xff]  ;;  %v78_v34 = vld [vmem:[%s2920_s0 + $0x68] sm:$0xff] }
   0x7   :  { %v96_v26 = vrot.slane %v94_v15, 1  ;;  %v101_v30 = vrot.slane %v99_v19, 1  ;;  %v115_v31 = vshll.u32 %v2101_v21, 16  ;;  %v119_v32 = vshrl.u32 %v2101_v21, 16  ;;  %v50_v39 = vld [vmem:[%s2921_s1] sm:$0xff]  ;;  %v52_v40 = vld [vmem:[%s2921_s1 + $0x10] sm:$0xff] }
   0x8   :  { %v109_v36 = vrot.slane %v107_v27, 1  ;;  %v123_v37 = vshll.u32 %v2103_v22, 16  ;;  %1995 = vmatprep.subr.msk.bf16.mxu0 %vm179_vm0, %v88_v29  ;;  %v2126_v38 = vpack.c.bf16 %v76_v25, %v75_v24  ;;  %v296_v43 = vsel %vm179_vm0, %v88_v29, 0  ;;  %v35_v45 = vld [vmem:[%s2919_s3 + $0x8] sm:$0xf]  ;;  %580 = vperm.xlu0 %2000, %v50_v39   ;;  %v53_v57 = vld [vmem:[%s2921_s1 + $0x18] sm:$0xff] }
   0x9   :  { %v97_v35 = vor.u32 %v96_v26, %v92_v14  ;;  %v105_v41 = vor.u32 %v103_v20, %v101_v30  ;;  %v117_v42 = vrot.slane %v115_v31, 1  ;;  %v127_v44 = vshrl.u32 %v2103_v22, 16  ;;  %590 = vperm.xlu1 %2001, %v52_v40   ;;  %v79_v50 = vld [vmem:[%s2920_s0 + $0x70] sm:$0xf]  ;;  %v51_v52 = vld [vmem:[%s2921_s1 + $0x8] sm:$0xff]  ;;  %v54_v2 = vld [vmem:[%s2921_s1 + $0x20] sm:$0xff] }
   0xa   :  { %v113_v47 = vor.u32 %v111_v28, %v109_v36  ;;  %v131_v48 = vshll.u32 %v2126_v38, 16  ;;  %v2141_v49 = vpack.c.bf16 %v78_v34, %v77_v33  ;;  %v125_v54 = vrot.slane %v123_v37, 1  ;;  %v55_v4 = vld [vmem:[%s2921_s1 + $0x28] sm:$0xff]  ;;  %v56_v15 = vld [vmem:[%s2921_s1 + $0x30] sm:$0xff]  ;;  %v57_v18 = vld [vmem:[%s2921_s1 + $0x38] sm:$0xff] }
   0xb   :  { %v102_v46 = vsel %vm90_vm1, %v97_v35, %v101_v30  ;;  %v110_v51 = vsel %vm90_vm1, %v105_v41, %v109_v36  ;;  %v394_v56 = vpack.c.bf16 %v35_v45, %v35_v45  ;;  %v121_v58 = vor.u32 %v119_v32, %v117_v42  ;;  %v58_v20 = vld [vmem:[%s2921_s1 + $0x40] sm:$0xff]  ;;  %v59_v23 = vld [vmem:[%s2921_s1 + $0x48] sm:$0xff]  ;;  %v60_v25 = vld [vmem:[%s2921_s1 + $0x50] sm:$0xff] }
   0xc   :  { %1793 = vmatprep.mubr.msk.bf16.mxu0 %vm154_vm2, %v102_v46  ;;  %v118_v53 = vsel %vm90_vm1, %v113_v47, %v117_v42  ;;  %v139_v55 = vshll.u32 %v2141_v49, 16  ;;  %v2158_v59 = vpack.c.bf16 %v79_v50, %v79_v50  ;;  %v143_v60 = vshrl.u32 %v2141_v49, 16  ;;  %585 = vperm.xlu0 %2000, %v51_v52   ;;  %v61_v26 = vld [vmem:[%s2921_s1 + $0x58] sm:$0xff]  ;;  %v62_v27 = vld [vmem:[%s2921_s1 + $0x60] sm:$0xff]  ;;  %v63_v28 = vld [vmem:[%s2921_s1 + $0x68] sm:$0xff] }
   0xd   :  { %1794 = vmatmul.mubr.msk.bf16.vlgmr.msra.gmra.mrb[0].mxu0 %vm154_vm2, %v110_v51  ;;  %v129_v61 = vor.u32 %v127_v44, %v125_v54  ;;  %v133_v62 = vrot.slane %v131_v48, 1  ;;  %595 = vperm.xlu1 %2001, %v53_v57   ;;  %v126_v5 = vsel %vm90_vm1, %v121_v58, %v125_v54  ;;  %v135_v7 = vshrl.u32 %v2126_v38, 16  ;;  %v64_v30 = vld [vmem:[%s2921_s1 + $0x70] sm:$0x3]  ;;  %v40_v42 = vld [vmem:[%s2922_s5 + $0x20] sm:$0xff]  ;;  %v47_v46 = vld [vmem:[%s2922_s5 + $0x58] sm:$0xff] }
   0xe   :  { %1797 = vmatprep.mubr.msk.bf16.mxu0 %vm154_vm2, %v118_v53  ;;  %1810 = vmatpush3.bf16.msra.mxu0 %v296_v43  ;;  %v141_v63 = vrot.slane %v139_v55, 1  ;;  %v147_v0 = vshll.u32 %v2158_v59, 16  ;;  %v151_v1 = vshrl.u32 %v2158_v59, 16  ;;  %v415_v11 = vrot.slane %v2141_v49, 1  ;;  %v41_v43 = vld [vmem:[%s2922_s5 + $0x28] sm:$0xff]  ;;  %v46_v44 = vld [vmem:[%s2922_s5 + $0x50] sm:$0xff] }
   0xf   :  { %1996 = vmatprep.subr.msk.bf16.mxu0 %vm179_vm0, %v394_v56  ;;  %v134_v10 = vsel %vm90_vm1, %v129_v61, %v133_v62  ;;  %v417_v12 = vrot.slane %v2158_v59, 1  ;;  %v137_v19 = vor.u32 %v135_v7, %v133_v62  ;;  %v444_v29 = vsel %vm179_vm0, %v394_v56, 0  ;;  %v42_v48 = vld [vmem:[%s2922_s5 + $0x30] sm:$0xff] }
  0x10   :  { %v145_v3 = vor.u32 %v143_v60, %v141_v63  ;;  %v149_v8 = vrot.slane %v147_v0, 1  ;;  %600 = vperm.xlu0 %2000, %v54_v2   ;;  %v404_v31 = vrot.slane %v2070_v6, 1  ;;  %v405_v32 = vrot.slane %v2075_v9, 1  ;;  %v2297_v2 = vld [vmem:[%s2923_s4] ss:$0 sm:$0xff] }
  0x11   :  { %605 = vperm.xlu1 %2001, %v55_v4   ;;  %v418_v17 = vsel %vm403_vm3, %v415_v11, %v417_v12  ;;  %v142_v24 = vsel %vm90_vm1, %v137_v19, %v141_v63  ;;  %v407_v34 = vrot.slane %v2090_v16, 1  ;;  %v409_v35 = vrot.slane %v2101_v21, 1 }
  0x12   :  { %v150_v13 = vsel %vm90_vm1, %v145_v3, %v149_v8  ;;  %v153_v14 = vor.u32 %v151_v1, %v149_v8  ;;  %v406_v33 = vsel %vm403_vm3, %v404_v31, %v405_v32  ;;  %v2003_v41 = vmov 0.0  }
  0x13   :  { %1805 = vmatprep.mubr.msk.bf16.mxu1 %vm154_vm2, %v150_v13  ;;  %v408_v36 = vsel %vm403_vm3, %v405_v32, %v407_v34  ;;  %v410_v37 = vsel %vm403_vm3, %v407_v34, %v409_v35  ;;  %1845 = vmatprep.subr.bf16.mxu1 %v2003_v41  ;;  %v693_v45 = vpack.c.bf16 %v41_v43, %v40_v42  ;;  %v36_v42 = vld [vmem:[%s2922_s5] sm:$0xff]  ;;  %v37_v43 = vld [vmem:[%s2922_s5 + $0x8] sm:$0xff] }
  0x14   :  { %1806 = vmatmul.mubr.msk.bf16.vlgmr.msra.gmra.mrb[0].mxu1 %vm154_vm2, %v153_v14  ;;  %610 = vperm.xlu0 %2000, %v56_v15   ;;  %v970_v47 = vpack.c.bf16 %v47_v46, %v46_v44 }
  0x15   :  { %1798 = vmatmul.mubr.msk.bf16.gmra.mrb[4].mxu0 %vm154_vm2, %v126_v5  ;;  %615 = vperm.xlu1 %2001, %v57_v18  }
  0x16   :  { %1801 = vmatprep.mubr.msk.bf16.mxu0 %vm154_vm2, %v134_v10  ;;  %1846 = vmatpush3.bf16.msra.mxu1 %v693_v45 }
  0x17   :  { %1847 = vmatprep.subr.bf16.mxu1 %v2003_v41  ;;  %1849 = vmatprep.mubr.msk.bf16.mxu1 %vm2004_vm4, %v2003_v41 }
  0x18   :  { %620 = vperm.xlu0 %2000, %v58_v20  }
  0x19   :  { %625 = vperm.xlu1 %2001, %v59_v23  }
  0x1c   :  { %630 = vperm.xlu0 %2000, %v60_v25  }
  0x1d   :  { %1802 = vmatmul.mubr.msk.bf16.gmra.mrb[8].mxu0 %vm154_vm2, %v142_v24  ;;  %635 = vperm.xlu1 %2001, %v61_v26  }
  0x1e   :  { %1811 = vmatprep.mubr.msk.bf16.mxu0 %vm154_vm2, %v2070_v6  ;;  %v411_v6 = vrot.slane %v2103_v22, 1 }
  0x20   :  { %640 = vperm.xlu0 %2000, %v62_v27   ;;  %v412_v39 = vsel %vm403_vm3, %v409_v35, %v411_v6 }
  0x21   :  { %645 = vperm.xlu1 %2001, %v63_v28  }
  0x24   :  { %650 = vperm.xlu0 %2000, %v64_v30  }
  0x25   :  { %1812 = vmatmul.mubr.msk.bf16.vlgmr.msra.gmra.mrb[0].mxu0 %vm154_vm2, %v2075_v9  ;;  %v413_v9 = vrot.slane %v2126_v38, 1 }
  0x26   :  { %1815 = vmatprep.mubr.msk.bf16.mxu0 %vm154_vm2, %v2090_v16  ;;  %1828 = vmatpush3.bf16.msra.mxu0 %v444_v29 }
  0x27   :  { %v414_v40 = vsel %vm403_vm3, %v411_v6, %v413_v9  ;;  %v416_v16 = vsel %vm403_vm3, %v413_v9, %v415_v11  ;;  %1909 = vmatprep.subr.bf16.mxu0 %v2003_v41 }
  0x2d   :  { %1816 = vmatmul.mubr.msk.bf16.gmra.mrb[4].mxu0 %vm154_vm2, %v2101_v21  ;;  %v44_v21 = vld [vmem:[%s2922_s5 + $0x40] sm:$0xff] }
  0x2e   :  { %1819 = vmatprep.mubr.msk.bf16.mxu0 %vm154_vm2, %v2103_v22  ;;  %v45_v22 = vld [vmem:[%s2922_s5 + $0x48] sm:$0xff] }
  0x35   :  { %1820 = vmatmul.mubr.msk.bf16.gmra.mrb[8].mxu0 %vm154_vm2, %v2126_v38  ;;  %v969_v38 = vpack.c.bf16 %v45_v22, %v44_v21 }
  0x36   :  { %1823 = vmatprep.mubr.msk.bf16.mxu0 %vm154_vm2, %v2141_v49  ;;  %v43_v49 = vld [vmem:[%s2922_s5 + $0x38] sm:$0xff] }
  0x37   :  { %v694_v50 = vpack.c.bf16 %v43_v49, %v42_v48 }
  0x39   :  { %1848 = vmatpush3.bf16.msra.mxu1 %v694_v50 }
  0x3a   :  { %1877 = vmatprep.subr.bf16.mxu1 %v2003_v41 }
  0x3d   :  { %1824 = vmatmul.mubr.msk.bf16.gmra.mrb[12].mxu0 %vm154_vm2, %v2158_v59 }
  0x3e   :  { %1829 = vmatprep.mubr.msk.bf16.mxu0 %vm154_vm2, %v406_v33 }
  0x45   :  { %1830 = vmatmul.mubr.msk.bf16.vlgmr.msra.gmra.mrb[0].mxu0 %vm154_vm2, %v408_v36 }
  0x46   :  { %1833 = vmatprep.mubr.msk.bf16.mxu0 %vm154_vm2, %v410_v37  ;;  %1910 = vmatpush3.bf16.msra.mxu0 %v969_v38 }
  0x47   :  { %1911 = vmatprep.subr.bf16.mxu0 %v2003_v41 }
  0x4a   :  { %1912 = vmatpush3.bf16.msra.mxu0 %v970_v47 }
  0x4d   :  { %1834 = vmatmul.mubr.msk.bf16.gmra.mrb[4].mxu0 %vm154_vm2, %v412_v39 }
  0x4e   :  { %1837 = vmatprep.mubr.msk.bf16.mxu0 %vm154_vm2, %v414_v40 }
  0x55   :  { %1838 = vmatmul.mubr.msk.bf16.gmra.mrb[8].mxu0 %vm154_vm2, %v416_v16 }
  0x56   :  { %1841 = vmatprep.mubr.msk.bf16.mxu0 %vm154_vm2, %v418_v17 }
  0x5d   :  { %1842 = vmatmul.mubr.msk.bf16.gmra.mrb[16].mxu0 %vm154_vm2, %v417_v12 }
  0x5e   :  { %1913 = vmatprep.mubr.msk.bf16.mxu0 %vm2004_vm4, %v2003_v41 }
  0x87   :  { %v2280_v55 = vpop.permute.xlu0 %580 }
  0x88   :  { %v2282_v56 = vpop.permute.xlu1 %590 }
  0x8b   :  { %v2286_v60 = vpop.permute.xlu0 %585 }
  0x8c   :  { %v2290_v0 = vpop.permute.xlu1 %595 }
  0x8f   :  { %v2299_v3 = vpop.permute.xlu0 %600 }
  0x90   :  { %v2302_v8 = vpop.permute.xlu1 %605 }
  0x93   :  { %v2310_v19 = vpop.permute.xlu0 %610 }
  0x94   :  { %v2313_v25 = vpop.permute.xlu1 %615 }
  0x97   :  { %v2324_v9 = vpop.permute.xlu0 %620 }
  0x98   :  { %v2338_v44 = vpop.permute.xlu1 %625 }
  0xe7   :  { %v1807_v51 = vpop.f32.mrb[0].mxu1 }
  0xe8   :  { %v265_v52 = vpop.f32.mrb[1].mxu1 }
  0xe9   :  { %v1808_v53 = vpop.f32.mrb[2].mxu1 }
  0xea   :  { %v268_v54 = vpop.f32.mrb[3].mxu1 }
 0x110   :  { %v1825_v57 = vpop.f32.mrb[12].mxu0 }
 0x111   :  { %v2284_v58 = vadd.f32 %v1825_v57, %v1807_v51  ;;  %v380_v59 = vpop.f32.mrb[13].mxu0 }
 0x112   :  { %v2288_v61 = vadd.f32 %v380_v59, %v265_v52  ;;  %v1826_v62 = vpop.f32.mrb[14].mxu0 }
 0x113   :  { %v383_v63 = vpop.f32.mrb[15].mxu0 }
 0x114   :  { %v2292_v1 = vadd.f32 %v383_v63, %v268_v54  ;;  %v690_v54 = vpack.c.bf16 %v37_v43, %v36_v42 }
 0x118   :  { %v1831_v4 = vpop.f32.mrb[0].mxu0 }
 0x119   :  { %v565_v5 = vadd.f32 %v1831_v4, %v2297_v2  ;;  %v480_v7 = vpop.f32.mrb[1].mxu0 }
 0x11a   :  { %v563_v10 = vadd.f32 %v2297_v2, %v480_v7  ;;  %v1832_v11 = vpop.f32.mrb[2].mxu0 }
 0x11b   :  { %v655_v12 = vmul.f32 %v2282_v56, %v565_v5  ;;  %v566_v13 = vadd.f32 %v1832_v11, %v2297_v2  ;;  %v483_v14 = vpop.f32.mrb[3].mxu0  ;;  %v2349_v5 = vpop.permute.xlu0 %630 }
 0x11c   :  { %v653_v15 = vmul.f32 %v2280_v55, %v563_v10  ;;  %v564_v17 = vadd.f32 %v2297_v2, %v483_v14 }
 0x11d   :  { %v656_v18 = vmul.f32 %v2290_v0, %v566_v13  ;;  %v670_v23 = vmax.f32 %v655_v12, 0.0  ;;  %v38_v12 = vld [vmem:[%s2922_s5 + $0x10] sm:$0xff]  ;;  %v39_v13 = vld [vmem:[%s2922_s5 + $0x18] sm:$0xff] }
 0x11e   :  { %v654_v20 = vmul.f32 %v2286_v60, %v564_v17  ;;  %v668_v26 = vmax.f32 %v653_v15, 0.0 }
 0x11f   :  { %v671_v24 = vmax.f32 %v656_v18, 0.0 }
 0x120   :  { %v669_v27 = vmax.f32 %v654_v20, 0.0  ;;  %v1835_v28 = vpop.f32.mrb[4].mxu0  ;;  %v2363_v20 = vpop.permute.xlu1 %635 }
 0x121   :  { %v2315_v29 = vpack.c.bf16 %v671_v24, %v670_v23  ;;  %v569_v30 = vadd.f32 %v1835_v28, %v2297_v2  ;;  %v496_v31 = vpop.f32.mrb[5].mxu0 }
 0x122   :  { %v2318_v32 = vpack.c.bf16 %v669_v27, %v668_v26  ;;  %v567_v33 = vadd.f32 %v2297_v2, %v496_v31  ;;  %v1836_v34 = vpop.f32.mrb[6].mxu0 }
 0x123   :  { %v659_v35 = vmul.f32 %v2310_v19, %v569_v30  ;;  %v570_v36 = vadd.f32 %v1836_v34, %v2297_v2  ;;  %v499_v37 = vpop.f32.mrb[7].mxu0  ;;  %v980_v6 = vrot.slane %v2315_v29, 1  ;;  %v703_v38 = vshll.u32 %v2315_v29, 16 }
 0x124   :  { %v657_v39 = vmul.f32 %v2299_v3, %v567_v33  ;;  %v568_v40 = vadd.f32 %v2297_v2, %v499_v37  ;;  %v979_v16 = vrot.slane %v2318_v32, 1  ;;  %v698_v22 = vshll.u32 %v2318_v32, 16 }
 0x125   :  { %v660_v21 = vmul.f32 %v2313_v25, %v570_v36  ;;  %v674_v47 = vmax.f32 %v659_v35, 0.0  ;;  %v696_v49 = vshrl.u32 %v2318_v32, 16  ;;  %v705_v4 = vrot.slane %v703_v38, 1 }
 0x126   :  { %v658_v45 = vmul.f32 %v2302_v8, %v568_v40  ;;  %v981_v46 = vsel %vm403_vm3, %v979_v16, %v980_v6  ;;  %v700_v50 = vrot.slane %v698_v22, 1  ;;  %v672_v51 = vmax.f32 %v657_v39, 0.0 }
 0x127   :  { %v675_v48 = vmax.f32 %v660_v21, 0.0  ;;  %1914 = vmatmul.mubr.msk.bf16.vlgmr.msra.gmra.mrb[20].mxu0 %vm755_vm5, %v981_v46  ;;  %v691_v30 = vpack.c.bf16 %v39_v13, %v38_v12  ;;  %v707_v36 = vshrl.u32 %v2315_v29, 16 }
 0x128   :  { %v673_v52 = vmax.f32 %v658_v45, 0.0  ;;  %v1839_v53 = vpop.f32.mrb[8].mxu0  ;;  %1917 = vmatprep.mubr.msk.bf16.mxu0 %vm2004_vm4, %v2003_v41  ;;  %v701_v63 = vor.u32 %v700_v50, %v696_v49 }
 0x129   :  { %v2346_v57 = vpack.c.bf16 %v675_v48, %v674_v47  ;;  %v573_v59 = vadd.f32 %v1839_v53, %v2297_v2  ;;  %v512_v62 = vpop.f32.mrb[9].mxu0  ;;  %v709_v38 = vor.u32 %v707_v36, %v705_v4 }
 0x12a   :  { %v2351_v7 = vpack.c.bf16 %v673_v52, %v672_v51  ;;  %v571_v10 = vadd.f32 %v2297_v2, %v512_v62  ;;  %v1840_v11 = vpop.f32.mrb[10].mxu0  ;;  %v706_v18 = vsel %vm90_vm1, %v701_v63, %v705_v4 }
 0x12b   :  { %v663_v14 = vmul.f32 %v2349_v5, %v573_v59  ;;  %v574_v15 = vadd.f32 %v1840_v11, %v2297_v2  ;;  %v515_v17 = vpop.f32.mrb[11].mxu0  ;;  %1850 = vmatmul.mubr.msk.bf16.vlgmr.msra.gmra.mrb[4].mxu1 %vm755_vm5, %v706_v18  ;;  %v984_v46 = vrot.slane %v2346_v57, 1  ;;  %v719_v51 = vshll.u32 %v2346_v57, 16  ;;  %v2401_v59 = vpop.permute.xlu1 %645 }
 0x12c   :  { %v661_v23 = vmul.f32 %v2324_v9, %v571_v10  ;;  %v572_v24 = vadd.f32 %v2297_v2, %v515_v17  ;;  %v982_v26 = vrot.slane %v2351_v7, 1  ;;  %v711_v27 = vshll.u32 %v2351_v7, 16  ;;  %1853 = vmatprep.mubr.msk.bf16.mxu1 %vm2004_vm4, %v2003_v41  ;;  %1878 = vmatpush3.bf16.msra.mxu1 %v690_v54 }
 0x12d   :  { %v664_v28 = vmul.f32 %v2363_v20, %v574_v15  ;;  %1879 = vmatprep.subr.bf16.mxu1 %v2003_v41  ;;  %v678_v34 = vmax.f32 %v663_v14, 0.0  ;;  %v721_v63 = vrot.slane %v719_v51, 1  ;;  %v723_v17 = vshrl.u32 %v2346_v57, 16 }
 0x12e   :  { %v662_v31 = vmul.f32 %v2338_v44, %v572_v24  ;;  %v983_v33 = vsel %vm403_vm3, %v980_v6, %v982_v26  ;;  %v713_v37 = vrot.slane %v711_v27, 1  ;;  %v676_v39 = vmax.f32 %v661_v23, 0.0 }
 0x12f   :  { %v679_v35 = vmax.f32 %v664_v28, 0.0  ;;  %1918 = vmatmul.mubr.msk.bf16.gmra.mrb[24].mxu0 %vm755_vm5, %v983_v33  ;;  %v985_v54 = vsel %vm403_vm3, %v982_v26, %v984_v46  ;;  %v725_v23 = vor.u32 %v723_v17, %v721_v63 }
 0x130   :  { %v677_v40 = vmax.f32 %v662_v31, 0.0  ;;  %v1843_v16 = vpop.f32.mrb[16].mxu0  ;;  %1921 = vmatprep.mubr.msk.bf16.mxu0 %vm2004_vm4, %v2003_v41  ;;  %1880 = vmatpush3.bf16.msra.mxu1 %v691_v30  ;;  %v714_v48 = vsel %vm90_vm1, %v709_v38, %v713_v37 }
 0x131   :  { %v2380_v21 = vpack.c.bf16 %v679_v35, %v678_v34  ;;  %v556_v22 = vadd.f32 %v1843_v16, %v2284_v58  ;;  %v528_v6 = vpop.f32.mrb[17].mxu0  ;;  %1941 = vmatprep.subr.bf16.mxu1 %v2003_v41  ;;  %v2392_v58 = vpop.permute.xlu0 %640 }
 0x132   :  { %v2383_v42 = vpack.c.bf16 %v677_v40, %v676_v39  ;;  %v554_v43 = vadd.f32 %v528_v6, %v2288_v61  ;;  %v1844_v45 = vpop.f32.mrb[18].mxu0  ;;  %v715_v61 = vshrl.u32 %v2351_v7, 16 }
 0x133   :  { %v531_v47 = vpop.f32.mrb[19].mxu0  ;;  %1854 = vmatmul.mubr.msk.bf16.gmra.mrb[8].mxu1 %vm755_vm5, %v714_v48  ;;  %v988_v24 = vrot.slane %v2380_v21, 1  ;;  %v577_v27 = vadd.f32 %v2297_v2, %v556_v22  ;;  %v735_v30 = vshll.u32 %v2380_v21, 16  ;;  %v739_v22 = vshrl.u32 %v2380_v21, 16 }
 0x134   :  { %v575_v49 = vadd.f32 %v2297_v2, %v554_v43  ;;  %v555_v50 = vadd.f32 %v531_v47, %v2292_v1  ;;  %1857 = vmatprep.mubr.msk.bf16.mxu1 %vm2004_vm4, %v2003_v41  ;;  %v717_v1 = vor.u32 %v715_v61, %v713_v37  ;;  %v986_v11 = vrot.slane %v2383_v42, 1 }
 0x135   :  { %v727_v13 = vshll.u32 %v2383_v42, 16  ;;  %v731_v28 = vshrl.u32 %v2383_v42, 16  ;;  %v2427_v33 = vpop.permute.xlu0 %650 }
 0x136   :  { %v665_v52 = vmul.f32 %v2392_v58, %v575_v49  ;;  %v576_v53 = vadd.f32 %v2297_v2, %v555_v50  ;;  %v722_v12 = vsel %vm90_vm1, %v717_v1, %v721_v63  ;;  %v987_v15 = vsel %vm403_vm3, %v984_v46, %v986_v11 }
 0x137   :  { %1922 = vmatmul.mubr.msk.bf16.gmra.mrb[28].mxu0 %vm755_vm5, %v985_v54  ;;  %v729_v18 = vrot.slane %v727_v13, 1  ;;  %v989_v31 = vsel %vm403_vm3, %v986_v11, %v988_v24  ;;  %v667_v35 = vmul.f32 %v2427_v33, %v577_v27  ;;  %v737_v2 = vrot.slane %v735_v30, 1 }
 0x138   :  { %v666_v62 = vmul.f32 %v2401_v59, %v576_v53  ;;  %1925 = vmatprep.mubr.msk.bf16.mxu0 %vm2004_vm4, %v2003_v41  ;;  %v680_v4 = vmax.f32 %v665_v52, 0.0 }
 0x139   :  { %v730_v26 = vsel %vm90_vm1, %v725_v23, %v729_v18  ;;  %v733_v34 = vor.u32 %v731_v28, %v729_v18  ;;  %v682_v40 = vmax.f32 %v667_v35, 0.0  ;;  %v741_v43 = vor.u32 %v739_v22, %v737_v2 }
 0x13a   :  { %v681_v10 = vmax.f32 %v666_v62, 0.0 }
 0x13b   :  { %1858 = vmatmul.mubr.msk.bf16.gmra.mrb[12].mxu1 %vm755_vm5, %v722_v12  ;;  %v738_v37 = vsel %vm90_vm1, %v733_v34, %v737_v2  ;;  %v692_v38 = vpack.c.bf16 %v682_v40, %v682_v40 }
 0x13c   :  { %v689_v14 = vpack.c.bf16 %v681_v10, %v680_v4  ;;  %1861 = vmatprep.mubr.msk.bf16.mxu1 %vm2004_vm4, %v2003_v41 }
 0x13d   :  { %v992_v46 = vrot.slane %v692_v38, 1  ;;  %v751_v47 = vshll.u32 %v692_v38, 16 }
 0x13e   :  { %v990_v36 = vrot.slane %v689_v14, 1  ;;  %v743_v39 = vshll.u32 %v689_v14, 16  ;;  %v747_v48 = vshrl.u32 %v689_v14, 16 }
 0x13f   :  { %1926 = vmatmul.mubr.msk.bf16.gmra.mrb[32].mxu0 %vm755_vm5, %v987_v15  ;;  %v753_v61 = vrot.slane %v751_v47, 1 }
 0x140   :  { %1929 = vmatprep.mubr.msk.bf16.mxu0 %vm2004_vm4, %v2003_v41  ;;  %v991_v16 = vsel %vm403_vm3, %v988_v24, %v990_v36  ;;  %v745_v6 = vrot.slane %v743_v39, 1  ;;  %v993_v49 = vsel %vm403_vm3, %v990_v36, %v992_v46 }
 0x142   :  { %v746_v45 = vsel %vm90_vm1, %v741_v43, %v745_v6  ;;  %v749_v50 = vor.u32 %v747_v48, %v745_v6 }
 0x143   :  { %1862 = vmatmul.mubr.msk.bf16.gmra.mrb[16].mxu1 %vm755_vm5, %v730_v26 }
 0x144   :  { %1865 = vmatprep.mubr.msk.bf16.mxu1 %vm2004_vm4, %v2003_v41  ;;  %v754_v51 = vsel %vm90_vm1, %v749_v50, %v753_v61 }
 0x147   :  { %1930 = vmatmul.mubr.msk.bf16.gmra.mrb[36].mxu0 %vm755_vm5, %v989_v31 }
 0x148   :  { %1933 = vmatprep.mubr.msk.bf16.mxu0 %vm2004_vm4, %v2003_v41 }
 0x14b   :  { %1866 = vmatmul.mubr.msk.bf16.gmra.mrb[20].mxu1 %vm755_vm5, %v738_v37 }
 0x14c   :  { %1869 = vmatprep.mubr.msk.bf16.mxu1 %vm2004_vm4, %v2003_v41 }
 0x14f   :  { %1934 = vmatmul.mubr.msk.bf16.gmra.mrb[40].mxu0 %vm755_vm5, %v991_v16 }
 0x150   :  { %1937 = vmatprep.mubr.msk.bf16.mxu0 %vm2004_vm4, %v2003_v41 }
 0x153   :  { %1870 = vmatmul.mubr.msk.bf16.gmra.mrb[24].mxu1 %vm755_vm5, %v746_v45 }
 0x154   :  { %1873 = vmatprep.mubr.msk.bf16.mxu1 %vm2004_vm4, %v2003_v41 }
 0x157   :  { %1938 = vmatmul.mubr.msk.bf16.gmra.mrb[44].mxu0 %vm755_vm5, %v993_v49 }
 0x15b   :  { %1874 = vmatmul.mubr.msk.bf16.gmra.mrb[28].mxu1 %vm755_vm5, %v754_v51 }
 0x15c   :  { %1881 = vmatprep.mubr.msk.bf16.mxu1 %vm2004_vm4, %v2003_v41 }
 0x163   :  { %1882 = vmatmul.mubr.msk.bf16.vlgmr.msra.gmra.mrb[32].mxu1 %vm755_vm5, %v2318_v32 }
 0x164   :  { %1885 = vmatprep.mubr.msk.bf16.mxu1 %vm2004_vm4, %v2003_v41 }
 0x16b   :  { %1886 = vmatmul.mubr.msk.bf16.gmra.mrb[36].mxu1 %vm755_vm5, %v2315_v29 }
 0x16c   :  { %1889 = vmatprep.mubr.msk.bf16.mxu1 %vm2004_vm4, %v2003_v41 }
 0x173   :  { %1890 = vmatmul.mubr.msk.bf16.gmra.mrb[40].mxu1 %vm755_vm5, %v2351_v7 }
 0x174   :  { %1893 = vmatprep.mubr.msk.bf16.mxu1 %vm2004_vm4, %v2003_v41 }
 0x17b   :  { %1894 = vmatmul.mubr.msk.bf16.gmra.mrb[44].mxu1 %vm755_vm5, %v2346_v57 }
 0x17c   :  { %1897 = vmatprep.mubr.msk.bf16.mxu1 %vm2004_vm4, %v2003_v41 }
 0x183   :  { %1898 = vmatmul.mubr.msk.bf16.gmra.mrb[48].mxu1 %vm755_vm5, %v2383_v42 }
 0x184   :  { %1901 = vmatprep.mubr.msk.bf16.mxu1 %vm2004_vm4, %v2003_v41 }
 0x18b   :  { %1902 = vmatmul.mubr.msk.bf16.gmra.mrb[52].mxu1 %vm755_vm5, %v2380_v21 }
 0x18c   :  { %1905 = vmatprep.mubr.msk.bf16.mxu1 %vm2004_vm4, %v2003_v41 }
 0x193   :  { %1906 = vmatmul.mubr.msk.bf16.gmra.mrb[56].mxu1 %vm755_vm5, %v689_v14 }
 0x194   :  { %1955 = vmatprep.mubr.msk.bf16.mxu1 %vm2004_vm4, %v2003_v41 }
 0x1fa   :  { %v2479_v29 = vpop.f32.mrb[20].mxu0 }
 0x1fb   :  { %v1915_v32 = vpop.f32.mrb[21].mxu0 }
 0x1fc   :  { %v2481_v57 = vpop.f32.mrb[22].mxu0 }
 0x1fd   :  { %v1916_v7 = vpop.f32.mrb[23].mxu0 }
 0x1fe   :  { %v811_v42 = vpop.f32.mrb[4].mxu1 }
 0x1ff   :  { %v1851_v52 = vpop.f32.mrb[5].mxu1 }
 0x200   :  { %v2483_v53 = vpop.f32.mrb[6].mxu1 }
 0x201   :  { %v1852_v54 = vpop.f32.mrb[7].mxu1 }
 0x202   :  { %v2485_v21 = vpop.f32.mrb[24].mxu0 }
 0x203   :  { %v1919_v1 = vpop.f32.mrb[25].mxu0 }
 0x204   :  { %v2487_v62 = vpop.f32.mrb[26].mxu0 }
 0x205   :  { %v1920_v63 = vpop.f32.mrb[27].mxu0 }
 0x206   :  { %v2489_v4 = vpop.f32.mrb[8].mxu1 }
 0x207   :  { %v1855_v10 = vpop.f32.mrb[9].mxu1 }
 0x208   :  { %v2491_v11 = vpop.f32.mrb[10].mxu1 }
 0x209   :  { %v1856_v12 = vpop.f32.mrb[11].mxu1 }
 0x20a   :  { %v2493_v13 = vpop.f32.mrb[28].mxu0 }
 0x20b   :  { %v1923_v14 = vpop.f32.mrb[29].mxu0 }
 0x20c   :  { %v2495_v15 = vpop.f32.mrb[30].mxu0  ;;  %v1139_v14 = vrot.slane %v2280_v55, 1 }
 0x20d   :  { %v1924_v17 = vpop.f32.mrb[31].mxu0 }
 0x20e   :  { %v2497_v18 = vpop.f32.mrb[12].mxu1  ;;  %v1140_v17 = vrot.slane %v2286_v60, 1  ;;  %v1152_v60 = vrot.slane %v2313_v25, 1 }
 0x20f   :  { %v1859_v23 = vpop.f32.mrb[13].mxu1 }
 0x210   :  { %v2499_v24 = vpop.f32.mrb[14].mxu1 }
 0x211   :  { %v1860_v26 = vpop.f32.mrb[15].mxu1 }
 0x212   :  { %v2501_v27 = vpop.f32.mrb[32].mxu0  ;;  %v1142_v26 = vrot.slane %v2282_v56, 1  ;;  %v1154_v56 = vrot.slane %v2324_v9, 1 }
 0x213   :  { %v1927_v28 = vpop.f32.mrb[33].mxu0 }
 0x214   :  { %v2503_v30 = vpop.f32.mrb[34].mxu0  ;;  %v1144_v28 = vrot.slane %v2290_v0, 1 }
 0x215   :  { %v1928_v31 = vpop.f32.mrb[35].mxu0 }
 0x216   :  { %v2505_v34 = vpop.f32.mrb[16].mxu1 }
 0x217   :  { %v1863_v35 = vpop.f32.mrb[17].mxu1 }
 0x218   :  { %v2507_v2 = vpop.f32.mrb[18].mxu1 }
 0x219   :  { %v1864_v36 = vpop.f32.mrb[19].mxu1 }
 0x21a   :  { %v2509_v37 = vpop.f32.mrb[36].mxu0  ;;  %v1146_v36 = vrot.slane %v2299_v3, 1  ;;  %v1141_v3 = vsel %vm403_vm3, %v1139_v14, %v1140_v17 }
 0x21b   :  { %v1931_v39 = vpop.f32.mrb[37].mxu0 }
 0x21c   :  { %v2511_v40 = vpop.f32.mrb[38].mxu0  ;;  %v1148_v39 = vrot.slane %v2302_v8, 1  ;;  %v1156_v8 = vrot.slane %v2338_v44, 1 }
 0x21d   :  { %v1932_v16 = vpop.f32.mrb[39].mxu0 }
 0x21e   :  { %v2513_v22 = vpop.f32.mrb[20].mxu1  ;;  %v1150_v16 = vrot.slane %v2310_v19, 1  ;;  %v1158_v19 = vrot.slane %v2349_v5, 1 }
 0x21f   :  { %v1867_v6 = vpop.f32.mrb[21].mxu1 }
 0x220   :  { %v2515_v38 = vpop.f32.mrb[22].mxu1  ;;  %v2543_v6 = vld [vmem:[%s2924_s6] ss:$0 sm:$0xff]  ;;  %v2563_v44 = vsel %vm403_vm3, %v1148_v39, %v1150_v16  ;;  %v2566_v5 = vsel %vm403_vm3, %v1150_v16, %v1152_v60 }
 0x221   :  { %v1868_v43 = vpop.f32.mrb[23].mxu1 }
 0x222   :  { %v2517_v45 = vpop.f32.mrb[40].mxu0 }
 0x223   :  { %v1935_v46 = vpop.f32.mrb[41].mxu0 }
 0x224   :  { %v2519_v47 = vpop.f32.mrb[42].mxu0  ;;  %v1160_v46 = vrot.slane %v2363_v20, 1  ;;  %v2569_v20 = vsel %vm403_vm3, %v1152_v60, %v1154_v56 }
 0x225   :  { %v1936_v48 = vpop.f32.mrb[43].mxu0 }
 0x226   :  { %v2521_v49 = vpop.f32.mrb[24].mxu1  ;;  %v1143_v48 = vsel %vm403_vm3, %v1140_v17, %v1142_v26 }
 0x227   :  { %v1871_v50 = vpop.f32.mrb[25].mxu1 }
 0x228   :  { %v2523_v61 = vpop.f32.mrb[26].mxu1  ;;  %v1162_v50 = vrot.slane %v2392_v58, 1 }
 0x229   :  { %v1872_v51 = vpop.f32.mrb[27].mxu1 }
 0x22a   :  { %v2525_v32 = vpop.f32.mrb[44].mxu0  ;;  %v2560_v51 = vsel %vm403_vm3, %v1146_v36, %v1148_v39  ;;  %v2583_v17 = vsel %vm403_vm3, %v1160_v46, %v1162_v50 }
 0x22b   :  { %v1939_v7 = vpop.f32.mrb[45].mxu0 }
 0x22c   :  { %v2527_v52 = vpop.f32.mrb[46].mxu0 }
 0x22d   :  { %v1940_v54 = vpop.f32.mrb[47].mxu0 }
 0x22e   :  { %v2529_v1 = vpop.f32.mrb[28].mxu1  ;;  %v2576_v54 = vsel %vm403_vm3, %v1156_v8, %v1158_v19 }
 0x22f   :  { %v1875_v63 = vpop.f32.mrb[29].mxu1 }
 0x230   :  { %v2531_v10 = vpop.f32.mrb[30].mxu1  ;;  %v2579_v63 = vsel %vm403_vm3, %v1158_v19, %v1160_v46 }
 0x231   :  { %v1876_v12 = vpop.f32.mrb[31].mxu1 }
 0x232   :  { %v1164_v12 = vrot.slane %v2401_v59, 1 }
 0x236   :  { %v914_v23 = vpop.f32.mrb[32].mxu1 }
 0x237   :  { %v915_v31 = vadd.f32 %v914_v23, %v811_v42  ;;  %v1883_v35 = vpop.f32.mrb[33].mxu1 }
 0x238   :  { %v917_v55 = vpop.f32.mrb[34].mxu1  ;;  %v1166_v35 = vrot.slane %v2427_v33, 1 }
 0x239   :  { %v1104_v0 = vadd.f32 %v2479_v29, %v915_v31  ;;  %v918_v42 = vadd.f32 %v917_v55, %v2483_v53  ;;  %v1884_v43 = vpop.f32.mrb[35].mxu1  ;;  %v1145_v29 = vsel %vm403_vm3, %v1142_v26, %v1144_v28  ;;  %v1147_v53 = vsel %vm403_vm3, %v1144_v28, %v1146_v36 }
 0x23b   :  { %v1124_v25 = vadd.f32 %v2543_v6, %v1104_v0  ;;  %v1105_v9 = vadd.f32 %v2481_v57, %v918_v42  ;;  %v2573_v57 = vsel %vm403_vm3, %v1154_v56, %v1156_v8 }
 0x23d   :  { %v1182_v58 = vmul.f32 %v1141_v3, %v1124_v25  ;;  %v1125_v7 = vadd.f32 %v2543_v6, %v1105_v9 }
 0x23e   :  { %v922_v14 = vpop.f32.mrb[36].mxu1 }
 0x23f   :  { %v2585_v23 = vmax.f32 %v1182_v58, 0.0  ;;  %v1183_v26 = vmul.f32 %v1143_v48, %v1125_v7  ;;  %v923_v28 = vadd.f32 %v922_v14, %v2489_v4  ;;  %v1887_v31 = vpop.f32.mrb[37].mxu1 }
 0x240   :  { %v925_v36 = vpop.f32.mrb[38].mxu1 }
 0x241   :  { %v2589_v39 = vmax.f32 %v1183_v26, 0.0  ;;  %v1106_v59 = vadd.f32 %v2485_v21, %v923_v28  ;;  %v926_v16 = vadd.f32 %v925_v36, %v2491_v11  ;;  %v1888_v55 = vpop.f32.mrb[39].mxu1  ;;  %v1224_v60 = vrot.slane %v2585_v23, 1 }
 0x242   :  { %v1280_v56 = vrot.slane %v2585_v23, 2  ;;  %v1336_v4 = vrot.slane %v2585_v23, 3  ;;  %v1392_v33 = vrot.slane %v2585_v23, 4  ;;  %v1448_v8 = vrot.slane %v2585_v23, 5 }
 0x243   :  { %v1126_v0 = vadd.f32 %v2543_v6, %v1106_v59  ;;  %v1107_v42 = vadd.f32 %v2487_v62, %v926_v16  ;;  %v1225_v43 = vrot.slane %v2589_v39, 1  ;;  %v1281_v21 = vrot.slane %v2589_v39, 2 }
 0x244   :  { %v1337_v11 = vrot.slane %v2589_v39, 3  ;;  %v1393_v3 = vrot.slane %v2589_v39, 4  ;;  %v1449_v19 = vrot.slane %v2589_v39, 5  ;;  %v2613_v28 = vsel %vm403_vm3, %v1162_v50, %v1164_v12 }
 0x245   :  { %v1184_v46 = vmul.f32 %v1145_v29, %v1126_v0  ;;  %v1127_v48 = vadd.f32 %v2543_v6, %v1107_v42  ;;  %v1226_v25 = vsel %vm403_vm3, %v1224_v60, %v1225_v43  ;;  %v1282_v9 = vsel %vm1279_vm6, %v1280_v56, %v1281_v21 }
 0x246   :  { %v930_v62 = vpop.f32.mrb[40].mxu1  ;;  %v1265_v58 = vmax.f32 %v2585_v23, %v1226_v25  ;;  %v1338_v7 = vsel %vm1335_vm7, %v1336_v4, %v1337_v11  ;;  %v1394_v14 = vsel %vm1391_vm8, %v1392_v33, %v1393_v3  ;;  %v1450_v26 = vsel %vm1447_vm9, %v1448_v8, %v1449_v19 }
 0x247   :  { %v2615_v31 = vmax.f32 %v1184_v46, 0.0  ;;  %v1185_v29 = vmul.f32 %v1147_v53, %v1127_v48  ;;  %v931_v36 = vadd.f32 %v930_v62, %v2497_v18  ;;  %v1891_v59 = vpop.f32.mrb[41].mxu1  ;;  %v2619_v16 = vsel %vm403_vm3, %v1164_v12, %v1166_v35 }
 0x248   :  { %v933_v55 = vpop.f32.mrb[42].mxu1  ;;  %v1321_v60 = vmax.f32 %v1265_v58, %v1282_v9  ;;  %v1503_v56 = vrot.slane %v2585_v23, 6  ;;  %v1504_v4 = vrot.slane %v2589_v39, 6 }
 0x249   :  { %v2623_v33 = vmax.f32 %v1185_v29, 0.0  ;;  %v1108_v50 = vadd.f32 %v2493_v13, %v931_v36  ;;  %v934_v0 = vadd.f32 %v933_v55, %v2499_v24  ;;  %v1892_v42 = vpop.f32.mrb[43].mxu1  ;;  %v1227_v53 = vrot.slane %v2615_v31, 1 }
 0x24a   :  { %v1283_v18 = vrot.slane %v2615_v31, 2  ;;  %v1339_v12 = vrot.slane %v2615_v31, 3  ;;  %v1377_v35 = vmax.f32 %v1321_v60, %v1338_v7  ;;  %v1395_v8 = vrot.slane %v2615_v31, 4 }
 0x24b   :  { %v1128_v23 = vadd.f32 %v2543_v6, %v1108_v50  ;;  %v1109_v46 = vadd.f32 %v2495_v15, %v934_v0  ;;  %v1228_v48 = vsel %vm403_vm3, %v1225_v43, %v1227_v53  ;;  %v1451_v13 = vrot.slane %v2615_v31, 5 }
 0x24c   :  { %v1266_v24 = vmax.f32 %v2589_v39, %v1228_v48  ;;  %v1284_v25 = vsel %vm1279_vm6, %v1281_v21, %v1283_v18  ;;  %v1340_v9 = vsel %vm1335_vm7, %v1337_v11, %v1339_v12  ;;  %v1396_v62 = vsel %vm1391_vm8, %v1393_v3, %v1395_v8 }
 0x24d   :  { %v1186_v58 = vmul.f32 %v2560_v51, %v1128_v23  ;;  %v1129_v7 = vadd.f32 %v2543_v6, %v1109_v46  ;;  %v1433_v29 = vmax.f32 %v1377_v35, %v1394_v14  ;;  %v1452_v15 = vsel %vm1447_vm9, %v1449_v19, %v1451_v13 }
 0x24e   :  { %v938_v43 = vpop.f32.mrb[44].mxu1  ;;  %v1322_v36 = vmax.f32 %v1266_v24, %v1284_v25  ;;  %v1505_v39 = vsel %vm179_vm0, %v1503_v56, %v1504_v4  ;;  %v1506_v21 = vrot.slane %v2615_v31, 6  ;;  %v1229_v11 = vrot.slane %v2623_v33, 1 }
 0x24f   :  { %v2649_v59 = vmax.f32 %v1186_v58, 0.0  ;;  %v1187_v3 = vmul.f32 %v2563_v44, %v1129_v7  ;;  %v939_v51 = vadd.f32 %v938_v43, %v2505_v34  ;;  %v1895_v55 = vpop.f32.mrb[45].mxu1  ;;  %v1489_v14 = vmax.f32 %v1433_v29, %v1450_v26 }
 0x250   :  { %v941_v60 = vpop.f32.mrb[46].mxu1  ;;  %v1378_v50 = vmax.f32 %v1322_v36, %v1340_v9  ;;  %v1507_v19 = vsel %vm179_vm0, %v1504_v4, %v1506_v21  ;;  %v1230_v56 = vsel %vm403_vm3, %v1227_v53, %v1229_v11  ;;  %v1285_v0 = vrot.slane %v2623_v33, 2 }
 0x251   :  { %v2658_v42 = vmax.f32 %v1187_v3, 0.0  ;;  %v1110_v35 = vadd.f32 %v2501_v27, %v939_v51  ;;  %v942_v44 = vadd.f32 %v941_v60, %v2507_v2  ;;  %v1896_v23 = vpop.f32.mrb[47].mxu1  ;;  %v1544_v34 = vmax.f32 %v1489_v14, %v1505_v39 }
 0x252   :  { %v1434_v46 = vmax.f32 %v1378_v50, %v1396_v62  ;;  %v1231_v26 = vrot.slane %v2649_v59, 1  ;;  %v1267_v48 = vmax.f32 %v2615_v31, %v1230_v56  ;;  %v1286_v24 = vsel %vm1279_vm6, %v1283_v18, %v1285_v0 }
 0x253   :  { %v1130_v4 = vadd.f32 %v2543_v6, %v1110_v35  ;;  %v1111_v53 = vadd.f32 %v2503_v30, %v942_v44  ;;  %v1287_v25 = vrot.slane %v2649_v59, 2  ;;  %v1341_v9 = vrot.slane %v2623_v33, 3 }
 0x254   :  { %v1490_v27 = vmax.f32 %v1434_v46, %v1452_v15  ;;  %v1232_v2 = vsel %vm403_vm3, %v1229_v11, %v1231_v26  ;;  %v1323_v58 = vmax.f32 %v1267_v48, %v1286_v24  ;;  %v1343_v62 = vrot.slane %v2649_v59, 3 }
 0x255   :  { %v1188_v7 = vmul.f32 %v2566_v5, %v1130_v4  ;;  %v1131_v29 = vadd.f32 %v2543_v6, %v1111_v53  ;;  %v1268_v18 = vmax.f32 %v2623_v33, %v1232_v2  ;;  %v1288_v30 = vsel %vm1279_vm6, %v1285_v0, %v1287_v25 }
 0x256   :  { %v946_v43 = vpop.f32.mrb[48].mxu1  ;;  %v1545_v36 = vmax.f32 %v1490_v27, %v1507_v19  ;;  %v1342_v39 = vsel %vm1335_vm7, %v1339_v12, %v1341_v9  ;;  %v1344_v15 = vsel %vm1335_vm7, %v1341_v9, %v1343_v62  ;;  %v1397_v11 = vrot.slane %v2623_v33, 4 }
 0x257   :  { %v2682_v3 = vmax.f32 %v1188_v7, 0.0  ;;  %v1189_v5 = vmul.f32 %v2569_v20, %v1131_v29  ;;  %v947_v51 = vadd.f32 %v946_v43, %v2513_v22  ;;  %v1899_v55 = vpop.f32.mrb[49].mxu1  ;;  %v1324_v14 = vmax.f32 %v1268_v18, %v1288_v30 }
 0x258   :  { %v949_v60 = vpop.f32.mrb[50].mxu1  ;;  %v1560_v50 = vpack.c.bf16 %v1545_v36, %v1544_v34  ;;  %v1379_v56 = vmax.f32 %v1323_v58, %v1342_v39  ;;  %v1398_v12 = vsel %vm1391_vm8, %v1395_v8, %v1397_v11  ;;  %v1399_v19 = vrot.slane %v2649_v59, 4 }
 0x259   :  { %v2690_v0 = vmax.f32 %v1189_v5, 0.0  ;;  %v1112_v35 = vadd.f32 %v2509_v37, %v947_v51  ;;  %v950_v44 = vadd.f32 %v949_v60, %v2515_v38  ;;  %v1900_v20 = vpop.f32.mrb[51].mxu1  ;;  %v1380_v23 = vmax.f32 %v1324_v14, %v1344_v15 }
 0x25a   :  { %1942 = vmatpush3.bf16.msra.mxu1 %v1560_v50  ;;  %v1400_v22 = vsel %vm1391_vm8, %v1397_v11, %v1399_v19  ;;  %v1435_v34 = vmax.f32 %v1379_v56, %v1398_v12  ;;  %v1453_v46 = vrot.slane %v2623_v33, 5  ;;  %v1455_v8 = vrot.slane %v2649_v59, 5 }
 0x25b   :  { %v1132_v48 = vadd.f32 %v2543_v6, %v1112_v35  ;;  %v1113_v24 = vadd.f32 %v2511_v40, %v950_v44  ;;  %1943 = vmatprep.subr.bf16.mxu1 %v2003_v41  ;;  %v1436_v37 = vmax.f32 %v1380_v23, %v1400_v22  ;;  %v1508_v38 = vrot.slane %v2623_v33, 6 }
 0x25c   :  { %v1454_v4 = vsel %vm1447_vm9, %v1451_v13, %v1453_v46  ;;  %v1456_v53 = vsel %vm1447_vm9, %v1453_v46, %v1455_v8  ;;  %v1510_v9 = vrot.slane %v2649_v59, 6  ;;  %v1233_v27 = vrot.slane %v2658_v42, 1 }
 0x25d   :  { %v1190_v2 = vmul.f32 %v2573_v57, %v1132_v48  ;;  %v1133_v40 = vadd.f32 %v2543_v6, %v1113_v24  ;;  %v1491_v58 = vmax.f32 %v1435_v34, %v1454_v4  ;;  %v1492_v7 = vmax.f32 %v1436_v37, %v1456_v53 }
 0x25e   :  { %v954_v29 = vpop.f32.mrb[52].mxu1  ;;  %v1509_v33 = vsel %vm179_vm0, %v1506_v21, %v1508_v38  ;;  %v1511_v13 = vsel %vm179_vm0, %v1508_v38, %v1510_v9  ;;  %v1234_v18 = vsel %vm403_vm3, %v1231_v26, %v1233_v27  ;;  %v1235_v30 = vrot.slane %v2682_v3, 1 }
 0x25f   :  { %v2721_v43 = vmax.f32 %v1190_v2, 0.0  ;;  %v1191_v57 = vmul.f32 %v2576_v54, %v1133_v40  ;;  %v955_v36 = vadd.f32 %v954_v29, %v2521_v49  ;;  %v1903_v39 = vpop.f32.mrb[53].mxu1  ;;  %v1546_v15 = vmax.f32 %v1491_v58, %v1509_v33 }
 0x260   :  { %v957_v11 = vpop.f32.mrb[54].mxu1  ;;  %v1547_v31 = vmax.f32 %v1492_v7, %v1511_v13  ;;  %v1236_v21 = vsel %vm403_vm3, %v1233_v27, %v1235_v30  ;;  %v1269_v5 = vmax.f32 %v2649_v59, %v1234_v18  ;;  %v1289_v26 = vrot.slane %v2658_v42, 2 }
 0x261   :  { %v2730_v51 = vmax.f32 %v1191_v57, 0.0  ;;  %v1114_v55 = vadd.f32 %v2517_v45, %v955_v36  ;;  %v958_v54 = vadd.f32 %v957_v11, %v2523_v61  ;;  %v1904_v14 = vpop.f32.mrb[55].mxu1  ;;  %v1270_v49 = vmax.f32 %v2658_v42, %v1236_v21 }
 0x262   :  { %v1561_v60 = vpack.c.bf16 %v1547_v31, %v1546_v15  ;;  %v1290_v50 = vsel %vm1279_vm6, %v1287_v25, %v1289_v26  ;;  %v1291_v56 = vrot.slane %v2682_v3, 2  ;;  %v1345_v12 = vrot.slane %v2658_v42, 3 }
 0x263   :  { %v1134_v35 = vadd.f32 %v2543_v6, %v1114_v55  ;;  %v1115_v44 = vadd.f32 %v2519_v47, %v958_v54  ;;  %v1325_v20 = vmax.f32 %v1269_v5, %v1290_v50  ;;  %v1347_v45 = vrot.slane %v2682_v3, 3 }
 0x264   :  { %1944 = vmatpush3.bf16.msra.mxu1 %v1561_v60  ;;  %v1292_v61 = vsel %vm1279_vm6, %v1289_v26, %v1291_v56  ;;  %v1346_v23 = vsel %vm1335_vm7, %v1343_v62, %v1345_v12  ;;  %v1401_v25 = vrot.slane %v2658_v42, 4  ;;  %v1403_v22 = vrot.slane %v2682_v3, 4 }
 0x265   :  { %v1192_v34 = vmul.f32 %v2579_v63, %v1134_v35  ;;  %v1135_v46 = vadd.f32 %v2543_v6, %v1115_v44  ;;  %1945 = vmatprep.subr.bf16.mxu1 %v2003_v41  ;;  %v1326_v47 = vmax.f32 %v1270_v49, %v1292_v61  ;;  %v1348_v48 = vsel %vm1335_vm7, %v1345_v12, %v1347_v45 }
 0x266   :  { %v962_v24 = vpop.f32.mrb[56].mxu1  ;;  %v1381_v37 = vmax.f32 %v1325_v20, %v1346_v23  ;;  %v1402_v62 = vsel %vm1391_vm8, %v1399_v19, %v1401_v25  ;;  %v1404_v38 = vsel %vm1391_vm8, %v1401_v25, %v1403_v22  ;;  %v1457_v63 = vrot.slane %v2658_v42, 5 }
 0x267   :  { %v2762_v4 = vmax.f32 %v1192_v34, 0.0  ;;  %v1193_v53 = vmul.f32 %v2583_v17, %v1135_v46  ;;  %v963_v27 = vadd.f32 %v962_v24, %v2529_v1  ;;  %v1907_v2 = vpop.f32.mrb[57].mxu1  ;;  %v1382_v40 = vmax.f32 %v1326_v47, %v1348_v48 }
 0x268   :  { %v965_v58 = vpop.f32.mrb[58].mxu1  ;;  %v1437_v7 = vmax.f32 %v1381_v37, %v1402_v62  ;;  %v1458_v19 = vsel %vm1447_vm9, %v1455_v8, %v1457_v63  ;;  %v1459_v29 = vrot.slane %v2682_v3, 5  ;;  %v1512_v33 = vrot.slane %v2658_v42, 6 }
 0x269   :  { %v2771_v13 = vmax.f32 %v1193_v53, 0.0  ;;  %v1116_v18 = vadd.f32 %v2525_v32, %v963_v27  ;;  %v966_v17 = vadd.f32 %v965_v58, %v2531_v10  ;;  %v1908_v57 = vpop.f32.mrb[59].mxu1  ;;  %v1438_v1 = vmax.f32 %v1382_v40, %v1404_v38 }
 0x26a   :  { %v1460_v36 = vsel %vm1447_vm9, %v1457_v63, %v1459_v29  ;;  %v1493_v39 = vmax.f32 %v1437_v7, %v1458_v19  ;;  %v1513_v15 = vsel %vm179_vm0, %v1510_v9, %v1512_v33  ;;  %v1514_v8 = vrot.slane %v2682_v3, 6 }
 0x26b   :  { %v1136_v11 = vadd.f32 %v2543_v6, %v1116_v18  ;;  %v1117_v42 = vadd.f32 %v2527_v52, %v966_v17  ;;  %v1494_v31 = vmax.f32 %v1438_v1, %v1460_v36  ;;  %v1237_v32 = vrot.slane %v2690_v0, 1 }
 0x26c   :  { %v1515_v10 = vsel %vm179_vm0, %v1512_v33, %v1514_v8  ;;  %v1548_v21 = vmax.f32 %v1493_v39, %v1513_v15  ;;  %v1239_v5 = vrot.slane %v2721_v43, 1  ;;  %v1293_v26 = vrot.slane %v2690_v0, 2 }
 0x26d   :  { %v1194_v59 = vmul.f32 %v2613_v28, %v1136_v11  ;;  %v1137_v9 = vadd.f32 %v2543_v6, %v1117_v42  ;;  %v1549_v55 = vmax.f32 %v1494_v31, %v1515_v10  ;;  %v1238_v54 = vsel %vm403_vm3, %v1235_v30, %v1237_v32 }
 0x26e   :  { %v1240_v52 = vsel %vm403_vm3, %v1237_v32, %v1239_v5  ;;  %v1271_v14 = vmax.f32 %v2682_v3, %v1238_v54  ;;  %v1294_v49 = vsel %vm1279_vm6, %v1291_v56, %v1293_v26  ;;  %v1295_v60 = vrot.slane %v2721_v43, 2 }
 0x26f   :  { %v2795_v50 = vmax.f32 %v1194_v59, 0.0  ;;  %v1195_v12 = vmul.f32 %v2619_v16, %v1137_v9  ;;  %v1562_v28 = vpack.c.bf16 %v1549_v55, %v1548_v21  ;;  %v1272_v6 = vmax.f32 %v2690_v0, %v1240_v52 }
 0x270   :  { %v1296_v35 = vsel %vm1279_vm6, %v1293_v26, %v1295_v60  ;;  %v1327_v44 = vmax.f32 %v1271_v14, %v1294_v49  ;;  %v1349_v30 = vrot.slane %v2690_v0, 3  ;;  %v1351_v20 = vrot.slane %v2721_v43, 3 }
 0x271   :  { %v2802_v61 = vmax.f32 %v1195_v12, 0.0  ;;  %1946 = vmatpush3.bf16.msra.mxu1 %v1562_v28  ;;  %v1328_v56 = vmax.f32 %v1272_v6, %v1296_v35  ;;  %v1405_v23 = vrot.slane %v2690_v0, 4  ;;  %v1407_v25 = vrot.slane %v2721_v43, 4 }
 0x272   :  { %1947 = vmatprep.subr.bf16.mxu1 %v2003_v41  ;;  %v1350_v16 = vsel %vm1335_vm7, %v1347_v45, %v1349_v30  ;;  %v1352_v34 = vsel %vm1335_vm7, %v1349_v30, %v1351_v20  ;;  %v1461_v46 = vrot.slane %v2690_v0, 5  ;;  %v1463_v47 = vrot.slane %v2721_v43, 5 }
 0x273   :  { %v1383_v48 = vmax.f32 %v1327_v44, %v1350_v16  ;;  %v1384_v24 = vmax.f32 %v1328_v56, %v1352_v34  ;;  %v1406_v37 = vsel %vm1391_vm8, %v1403_v22, %v1405_v23  ;;  %v1408_v62 = vsel %vm1391_vm8, %v1405_v23, %v1407_v25 }
 0x274   :  { %v1462_v38 = vsel %vm1447_vm9, %v1459_v29, %v1461_v46  ;;  %v1464_v63 = vsel %vm1447_vm9, %v1461_v46, %v1463_v47  ;;  %v1516_v45 = vrot.slane %v2690_v0, 6  ;;  %v1518_v53 = vrot.slane %v2721_v43, 6 }
 0x275   :  { %v1439_v27 = vmax.f32 %v1383_v48, %v1406_v37  ;;  %v1440_v2 = vmax.f32 %v1384_v24, %v1408_v62  ;;  %v1241_v40 = vrot.slane %v2730_v51, 1  ;;  %v1243_v58 = vrot.slane %v2762_v4, 1 }
 0x276   :  { %v1517_v3 = vsel %vm179_vm0, %v1514_v8, %v1516_v45  ;;  %v1519_v22 = vsel %vm179_vm0, %v1516_v45, %v1518_v53  ;;  %v1297_v7 = vrot.slane %v2730_v51, 2  ;;  %v1299_v19 = vrot.slane %v2762_v4, 2 }
 0x277   :  { %v1495_v29 = vmax.f32 %v1439_v27, %v1462_v38  ;;  %v1496_v33 = vmax.f32 %v1440_v2, %v1464_v63  ;;  %v1242_v0 = vsel %vm403_vm3, %v1239_v5, %v1241_v40  ;;  %v1244_v18 = vsel %vm403_vm3, %v1241_v40, %v1243_v58 }
 0x278   :  { %v1273_v17 = vmax.f32 %v2721_v43, %v1242_v0  ;;  %v1274_v57 = vmax.f32 %v2730_v51, %v1244_v18  ;;  %v1298_v1 = vsel %vm1279_vm6, %v1295_v60, %v1297_v7  ;;  %v1300_v36 = vsel %vm1279_vm6, %v1297_v7, %v1299_v19 }
 0x279   :  { %v1550_v39 = vmax.f32 %v1495_v29, %v1517_v3  ;;  %v1551_v15 = vmax.f32 %v1496_v33, %v1519_v22  ;;  %v1353_v8 = vrot.slane %v2730_v51, 3  ;;  %v1355_v11 = vrot.slane %v2762_v4, 3 }
 0x27a   :  { %v1329_v42 = vmax.f32 %v1273_v17, %v1298_v1  ;;  %v1330_v31 = vmax.f32 %v1274_v57, %v1300_v36  ;;  %v1409_v32 = vrot.slane %v2730_v51, 4  ;;  %v1411_v10 = vrot.slane %v2762_v4, 4 }
 0x27b   :  { %v1563_v21 = vpack.c.bf16 %v1551_v15, %v1550_v39  ;;  %v1354_v43 = vsel %vm1335_vm7, %v1351_v20, %v1353_v8  ;;  %v1356_v5 = vsel %vm1335_vm7, %v1353_v8, %v1355_v11  ;;  %v1465_v26 = vrot.slane %v2730_v51, 5 }
 0x27c   :  { %v1385_v59 = vmax.f32 %v1329_v42, %v1354_v43  ;;  %v1386_v9 = vmax.f32 %v1330_v31, %v1356_v5  ;;  %v1410_v55 = vsel %vm1391_vm8, %v1407_v25, %v1409_v32  ;;  %v1412_v54 = vsel %vm1391_vm8, %v1409_v32, %v1411_v10 }
 0x27d   :  { %1948 = vmatpush3.bf16.msra.mxu1 %v1563_v21  ;;  %v1466_v52 = vsel %vm1447_vm9, %v1463_v47, %v1465_v26  ;;  %v1467_v14 = vrot.slane %v2762_v4, 5  ;;  %v1520_v49 = vrot.slane %v2730_v51, 6  ;;  %v1522_v60 = vrot.slane %v2762_v4, 6 }
 0x27e   :  { %1949 = vmatprep.subr.bf16.mxu1 %v2003_v41  ;;  %v1441_v12 = vmax.f32 %v1385_v59, %v1410_v55  ;;  %v1442_v28 = vmax.f32 %v1386_v9, %v1412_v54  ;;  %v1245_v6 = vrot.slane %v2771_v13, 1  ;;  %v1247_v35 = vrot.slane %v2795_v50, 1 }
 0x27f   :  { %v1468_v44 = vsel %vm1447_vm9, %v1465_v26, %v1467_v14  ;;  %v1521_v30 = vsel %vm179_vm0, %v1518_v53, %v1520_v49  ;;  %v1523_v20 = vsel %vm179_vm0, %v1520_v49, %v1522_v60  ;;  %v1301_v56 = vrot.slane %v2771_v13, 2 }
 0x280   :  { %v1497_v23 = vmax.f32 %v1441_v12, %v1466_v52  ;;  %v1498_v51 = vmax.f32 %v1442_v28, %v1468_v44  ;;  %v1246_v25 = vsel %vm403_vm3, %v1243_v58, %v1245_v6  ;;  %v1248_v16 = vsel %vm403_vm3, %v1245_v6, %v1247_v35 }
 0x281   :  { %v1275_v34 = vmax.f32 %v2762_v4, %v1246_v25  ;;  %v1276_v46 = vmax.f32 %v2771_v13, %v1248_v16  ;;  %v1302_v47 = vsel %vm1279_vm6, %v1299_v19, %v1301_v56  ;;  %v1303_v48 = vrot.slane %v2795_v50, 2  ;;  %v1615_v25 = vld [vmem:[%s2926_s7] sm:$0xff]  ;;  %v1616_v16 = vld [vmem:[%s2926_s7 + $0x8] sm:$0xff] }
 0x282   :  { %v1552_v24 = vmax.f32 %v1497_v23, %v1521_v30  ;;  %v1553_v37 = vmax.f32 %v1498_v51, %v1523_v20  ;;  %v1357_v62 = vrot.slane %v2771_v13, 3  ;;  %v1359_v38 = vrot.slane %v2795_v50, 3  ;;  %v1558_v23 = vld [vmem:[%s2925_s2] sm:$0x3f] }
 0x283   :  { %v1304_v63 = vsel %vm1279_vm6, %v1301_v56, %v1303_v48  ;;  %v1331_v45 = vmax.f32 %v1275_v34, %v1302_v47  ;;  %v1413_v53 = vrot.slane %v2771_v13, 4  ;;  %v1415_v27 = vrot.slane %v2795_v50, 4 }
 0x284   :  { %v1564_v4 = vpack.c.bf16 %v1553_v37, %v1552_v24  ;;  %v1332_v2 = vmax.f32 %v1276_v46, %v1304_v63  ;;  %v1358_v40 = vsel %vm1335_vm7, %v1355_v11, %v1357_v62  ;;  %v1360_v58 = vsel %vm1335_vm7, %v1357_v62, %v1359_v38  ;;  %v1618_v24 = vld [vmem:[%s2926_s7 + $0x18] sm:$0xff] }
 0x285   :  { %v1387_v3 = vmax.f32 %v1331_v45, %v1358_v40  ;;  %v1414_v22 = vsel %vm1391_vm8, %v1411_v10, %v1413_v53  ;;  %v1416_v7 = vsel %vm1391_vm8, %v1413_v53, %v1415_v27  ;;  %v1469_v19 = vrot.slane %v2771_v13, 5 }
 0x286   :  { %1950 = vmatpush3.bf16.msra.mxu1 %v1564_v4  ;;  %v1388_v29 = vmax.f32 %v1332_v2, %v1360_v58  ;;  %v1471_v33 = vrot.slane %v2795_v50, 5  ;;  %v1524_v0 = vrot.slane %v2771_v13, 6  ;;  %v1526_v18 = vrot.slane %v2795_v50, 6 }
 0x287   :  { %1951 = vmatprep.subr.bf16.mxu1 %v2003_v41  ;;  %v1443_v17 = vmax.f32 %v1387_v3, %v1414_v22  ;;  %v1470_v57 = vsel %vm1447_vm9, %v1467_v14, %v1469_v19  ;;  %v1249_v1 = vrot.slane %v2802_v61, 1  ;;  %v1305_v36 = vrot.slane %v2802_v61, 2 }
 0x288   :  { %v1444_v39 = vmax.f32 %v1388_v29, %v1416_v7  ;;  %v1472_v15 = vsel %vm1447_vm9, %v1469_v19, %v1471_v33  ;;  %v1525_v8 = vsel %vm179_vm0, %v1522_v60, %v1524_v0  ;;  %v1527_v11 = vsel %vm179_vm0, %v1524_v0, %v1526_v18 }
 0x289   :  { %v1499_v42 = vmax.f32 %v1443_v17, %v1470_v57  ;;  %v1250_v13 = vsel %vm403_vm3, %v1247_v35, %v1249_v1  ;;  %v1278_v31 = vmax.f32 %v2802_v61, %v1249_v1  ;;  %v1306_v32 = vsel %vm1279_vm6, %v1303_v48, %v1305_v36  ;;  %v1617_v48 = vld [vmem:[%s2926_s7 + $0x10] sm:$0xff] }
 0x28a   :  { %v1500_v10 = vmax.f32 %v1444_v39, %v1472_v15  ;;  %v1277_v21 = vmax.f32 %v2795_v50, %v1250_v13  ;;  %v1361_v43 = vrot.slane %v2802_v61, 3  ;;  %v1417_v5 = vrot.slane %v2802_v61, 4 }
 0x28b   :  { %v1554_v26 = vmax.f32 %v1499_v42, %v1525_v8  ;;  %v1334_v59 = vmax.f32 %v1278_v31, %v1305_v36  ;;  %v1473_v9 = vrot.slane %v2802_v61, 5  ;;  %v1528_v55 = vrot.slane %v2802_v61, 6 }
 0x28c   :  { %v1555_v54 = vmax.f32 %v1500_v10, %v1527_v11  ;;  %v1333_v52 = vmax.f32 %v1277_v21, %v1306_v32  ;;  %v1362_v14 = vsel %vm1335_vm7, %v1359_v38, %v1361_v43  ;;  %v1418_v49 = vsel %vm1391_vm8, %v1415_v27, %v1417_v5 }
 0x28d   :  { %v1390_v60 = vmax.f32 %v1334_v59, %v1361_v43  ;;  %v1474_v12 = vsel %vm1447_vm9, %v1471_v33, %v1473_v9  ;;  %v1529_v50 = vsel %vm179_vm0, %v1526_v18, %v1528_v55  ;;  %v1559_v46 = vpack.c.bf16 %v1558_v23, %v1558_v23 }
 0x28e   :  { %v1565_v28 = vpack.c.bf16 %v1555_v54, %v1554_v26  ;;  %v1389_v6 = vmax.f32 %v1333_v52, %v1362_v14  ;;  %v1619_v47 = vpack.c.bf16 %v1616_v16, %v1615_v25  ;;  %v1620_v37 = vpack.c.bf16 %v1618_v24, %v1617_v48 }
 0x28f   :  { %v1446_v35 = vmax.f32 %v1390_v60, %v1417_v5 }
 0x290   :  { %1952 = vmatpush3.bf16.msra.mxu1 %v1565_v28  ;;  %v1445_v44 = vmax.f32 %v1389_v6, %v1418_v49 }
 0x291   :  { %1953 = vmatprep.subr.bf16.mxu1 %v2003_v41  ;;  %v1502_v30 = vmax.f32 %v1446_v35, %v1473_v9 }
 0x292   :  { %v1501_v61 = vmax.f32 %v1445_v44, %v1474_v12 }
 0x293   :  { %v1557_v20 = vmax.f32 %v1502_v30, %v1528_v55 }
 0x294   :  { %v1556_v56 = vmax.f32 %v1501_v61, %v1529_v50 }
 0x296   :  { %v1566_v51 = vpack.c.bf16 %v1557_v20, %v1556_v56 }
 0x298   :  { %v1572_v34 = vsel %vm1335_vm7, %v1566_v51, 0 }
 0x299   :  { %1954 = vmatpush3.bf16.msra.mxu1 %v1572_v34 }
 0x29a   :  { %1959 = vmatprep.subr.bf16.mxu1 %v2003_v41 }
 0x29c   :  { %1956 = vmatmul.mubr.msk.bf16.vlgmr.msra.gmra.mrb[60].mxu1 %vm1567_vm10, %v1559_v46 }
 0x29d   :  { %1960 = vmatpush3.bf16.msra.mxu1 %v1619_v47  ;;  %1963 = vmatprep.mubr.msk.bf16.mxu1 %vm2004_vm4, %v2003_v41 }
 0x29e   :  { %1961 = vmatprep.subr.bf16.mxu1 %v2003_v41  ;;  %v1724_v41 = vld [vmem:[%s2927_s8] ss:$0 sm:$0xff] }
 0x2a1   :  { %1962 = vmatpush3.bf16.msra.mxu1 %v1620_v37 }
 0x36f   :  { %v1608_v62 = vpop.f32.mrb[60].mxu1 }
 0x370   :  { %v1614_v38 = vpack.c.bf16 %v1608_v62, %v1608_v62  ;;  %v1957_v63 = vpop.f32.mrb[61].mxu1 }
 0x371   :  { %v1611_v45 = vpop.f32.mrb[62].mxu1 }
 0x372   :  { %v1958_v53 = vpop.f32.mrb[63].mxu1  ;;  %1964 = vmatmul.mubr.msk.bf16.vlgmr.msra.gmra.mrb[64].mxu1 %vm755_vm5, %v1614_v38 }
 0x445   :  { %v1665_v27 = vpop.f32.mrb[64].mxu1 }
 0x446   :  { %v1666_v4 = vadd.f32 %v1724_v41, %v1665_v27  ;;  %v1965_v2 = vpop.f32.mrb[65].mxu1 }
 0x447   :  { %v1668_v40 = vpop.f32.mrb[66].mxu1 }
 0x448   :  { %1671 = vst [vmem:[%s2928_s9] sm:$0x3f] %v1666_v4  ;;  %v1966_v58 = vpop.f32.mrb[67].mxu1 }

</bundles_post_ra>
